<compile_context>
chip_gen: v7x
topology: tpu7x:2x2x1
jax: 0.10.0
libtpu: 0.0.40
codegen_flags: <defaults>
</compile_context>

<pallas_src>
import jax
import jax.numpy as jnp
import numpy as np
from jax.experimental import pallas as pl
from jax.experimental.pallas import tpu as pltpu


# ---------------------------------------------------------------------------
# Pallas kernels
# ---------------------------------------------------------------------------
def _linear_kernel(x_ref, wt_ref, b_ref, o_ref):
    # y = x @ W^T + b.  wt_ref holds W^T (K, N); b_ref is (1, N).
    o_ref[...] = (
        jnp.dot(x_ref[...], wt_ref[...], preferred_element_type=jnp.float32)
        + b_ref[...]
    )


def pallas_linear(x, wt, b2d, *, block_rows=512):
    """Row-tiled linear.  x: (M, K), wt: (K, N) pre-transposed, b2d: (1, N)."""
    M, K = x.shape
    N = wt.shape[1]
    bm = M if M <= block_rows else block_rows          # block_rows % 8 == 0
    grid = (pl.cdiv(M, bm),)
    return pl.pallas_call(
        _linear_kernel,
        grid=grid,
        in_specs=[
            pl.BlockSpec((bm, K), lambda i: (i, 0)),
            pl.BlockSpec((K, N), lambda i: (0, 0)),
            pl.BlockSpec((1, N), lambda i: (0, 0)),
        ],
        out_specs=pl.BlockSpec((bm, N), lambda i: (i, 0)),
        out_shape=jax.ShapeDtypeStruct((M, N), jnp.float32),
        compiler_params=pltpu.CompilerParams(dimension_semantics=("parallel",)),
    )(x, wt, b2d)


def _bigru_kernel(gx_ref, whh_ref, bhh_ref, hseq_ref, h_scr):
    # gx_ref   : (CT, B, 6H) precomputed input gates; lanes [r_f r_b z_f z_b n_f n_b];
    #            backward lanes are pre-reversed in time.
    # whh_ref  : (2H, 6H)    block-diagonal recurrent weights (fwd rows 0:H, bwd rows H:2H)
    # bhh_ref  : (1, 6H)     recurrent biases, same lane order
    # hseq_ref : (CT, B, 2H) per-timestep hidden [h_f | h_b]
    # h_scr    : (B, 2H)     hidden state carried across T-chunks
    @pl.when(pl.program_id(0) == 0)
    def _():
        h_scr[...] = jnp.zeros_like(h_scr)

    whh = whh_ref[...]          # hoisted: loaded once per chunk
    bhh = bhh_ref[...]
    H2 = h_scr.shape[1]         # 2H
    steps = gx_ref.shape[0]     # static chunk length

    def body(t, h):
        gx = gx_ref[t]                                             # (B, 6H)
        gh = jnp.dot(h, whh, preferred_element_type=jnp.float32) + bhh
        r = jax.nn.sigmoid(gx[:, :H2] + gh[:, :H2])
        z = jax.nn.sigmoid(gx[:, H2:2 * H2] + gh[:, H2:2 * H2])
        n = jnp.tanh(gx[:, 2 * H2:] + r * gh[:, 2 * H2:])
        h_new = (1.0 - z) * n + z * h
        hseq_ref[t] = h_new
        return h_new

    h_final = jax.lax.fori_loop(0, steps, body, h_scr[...],
                                unroll=min(steps, 8))
    h_scr[...] = h_final


def bigru_layer(gx_k, whh_blk, bhh_k, *, B, H, chunk_t=None):
    """Fused forward+backward GRU layer.  gx_k: (T, B, 6H) -> hseq (T, B, 2H)."""
    T = gx_k.shape[0]
    ct = T if chunk_t is None else min(chunk_t, T)
    n_chunks = pl.cdiv(T, ct)
    return pl.pallas_call(
        _bigru_kernel,
        grid=(n_chunks,),
        in_specs=[
            pl.BlockSpec((ct, B, 6 * H), lambda c: (c, 0, 0)),
            pl.BlockSpec((2 * H, 6 * H), lambda c: (0, 0)),
            pl.BlockSpec((1, 6 * H), lambda c: (0, 0)),
        ],
        out_specs=pl.BlockSpec((ct, B, 2 * H), lambda c: (c, 0, 0)),
        out_shape=jax.ShapeDtypeStruct((T, B, 2 * H), jnp.float32),
        scratch_shapes=[pltpu.VMEM((B, 2 * H), jnp.float32)],
        # Sequential carry over T-chunks -> must stay 'arbitrary', never 'parallel'.
        compiler_params=pltpu.CompilerParams(dimension_semantics=("arbitrary",)),
    )(gx_k, whh_blk, bhh_k)


# ---------------------------------------------------------------------------
# One-time weight packing (pre-transpose / pre-permute; no per-call transposes)
# ---------------------------------------------------------------------------
def pack_params(params, *, num_layers, hidden_size, context_mode):
    H = hidden_size
    packed = {"layers": []}
    for l in range(num_layers):
        g = params["gru"][l]
        in_l = g["w_ih_f"].shape[1]
        # Input-gate weights for both directions, rows interleaved per gate:
        # [r_f r_b z_f z_b n_f n_b] -> matmul output is directly in kernel lane order.
        w_ih_i = jnp.stack([g["w_ih_f"].reshape(3, H, in_l),
                            g["w_ih_b"].reshape(3, H, in_l)], axis=1).reshape(6 * H, in_l)
        b_ih_i = jnp.stack([g["b_ih_f"].reshape(3, H),
                            g["b_ih_b"].reshape(3, H)], axis=1).reshape(1, 6 * H)
        # Block-diagonal recurrent weights, same interleaved lane order.
        wf_t = jnp.transpose(g["w_hh_f"].reshape(3, H, H), (2, 0, 1))   # (in, gate, out)
        wb_t = jnp.transpose(g["w_hh_b"].reshape(3, H, H), (2, 0, 1))
        blk = jnp.zeros((2 * H, 3, 2, H), jnp.float32)
        blk = blk.at[:H, :, 0, :].set(wf_t)
        blk = blk.at[H:, :, 1, :].set(wb_t)
        whh_blk = blk.reshape(2 * H, 6 * H)
        b_hh_i = jnp.stack([g["b_hh_f"].reshape(3, H),
                            g["b_hh_b"].reshape(3, H)], axis=1).reshape(1, 6 * H)
        packed["layers"].append({
            "w_ih_T": w_ih_i.T,                      # (F, 6H)
            "b_ih": b_ih_i,                          # (1, 6H)
            "whh_blk": whh_blk,                      # (2H, 6H)
            "b_hh": b_hh_i,                          # (1, 6H)
        })
    packed["qz0_wT"] = params["qz0_w"].T
    packed["qz0_b"] = params["qz0_b"].reshape(1, -1)
    if context_mode in ("full", "constant"):
        packed["lin_wT"] = params["lin_w"].T
        packed["lin_b"] = params["lin_b"].reshape(1, -1)
    return packed


# ---------------------------------------------------------------------------
# Encoder forward (wrapper / glue)
# ---------------------------------------------------------------------------
def encoder_forward(inp, packed, *, num_layers, hidden_size, context_size,
                    latent_size, context_mode="full", chunk_t=None):
    T, B, _ = inp.shape
    H = hidden_size
    # Lane masks (built once): backward gate lanes in [r_f r_b z_f z_b n_f n_b],
    # backward hidden lanes in [h_f | h_b].
    bwd_gate_lanes = (jnp.arange(6 * H) // H) % 2 == 1
    bwd_h_lanes = jnp.arange(2 * H) >= H

    layer_in = inp
    fins = []
    for l in range(num_layers):
        p = packed["layers"][l]
        F = layer_in.shape[-1]
        # One fused time-parallel input-gate matmul for both directions; output is
        # already in kernel lane order thanks to the packed row permutation.
        gx = pallas_linear(layer_in.reshape(T * B, F), p["w_ih_T"], p["b_ih"])  # (T*B, 6H)
        gx = gx.reshape(T, B, 6 * H)
        # Backward lanes take the time-reversed gate stream (layout-preserving select,
        # no minor-dim transpose).
        gx_k = jnp.where(bwd_gate_lanes, gx[::-1], gx)

        hseq = bigru_layer(gx_k, p["whh_blk"], p["b_hh"], B=B, H=H, chunk_t=chunk_t)

        # Next-layer input: [h_f(t) | h_b(t)] in original time order.
        layer_in = jnp.where(bwd_h_lanes, hseq[::-1], hseq)       # (T, B, 2H)
        fins.append(hseq[T - 1, :, :H])                           # fwd final (t = T-1)
        fins.append(hseq[T - 1, :, H:])                           # bwd final (original t = 0)

    seq_out = layer_in                                            # (T, B, 2H)
    fin_flat = jnp.stack(fins, 0).transpose(1, 0, 2).reshape(B, 2 * num_layers * H)
    qz0_params = pallas_linear(fin_flat, packed["qz0_wT"], packed["qz0_b"])

    if context_mode == "full":
        ctx = pallas_linear(seq_out.reshape(T * B, 2 * H),
                            packed["lin_wT"], packed["lin_b"])
        ctx = ctx.reshape(T, B, context_size)
    elif context_mode == "constant":
        c = pallas_linear(fin_flat, packed["lin_wT"], packed["lin_b"])
        ctx = jnp.broadcast_to(c[None], (T, B, context_size))
    else:  # 'ic_only' -> NaN-filled context (plain JAX fill, no compute)
        ctx = jnp.full((T, B, context_size), jnp.nan, dtype=jnp.float32)
    return ctx, qz0_params


# ---------------------------------------------------------------------------
# Parameter init (PyTorch nn.GRU / nn.Linear layout) and pure-JAX reference
# ---------------------------------------------------------------------------
def init_params(key, input_size, hidden_size, context_size, latent_size,
                num_layers, context_mode="full"):
    H = hidden_size
    k = 1.0 / np.sqrt(H)
    params = {"gru": []}
    for l in range(num_layers):
        in_l = input_size if l == 0 else 2 * hidden_size
        layer = {}
        for d in ("f", "b"):
            key, k0, k1, k2, k3 = jax.random.split(key, 5)
            layer[f"w_ih_{d}"] = jax.random.uniform(k0, (3 * H, in_l), jnp.float32, -k, k)
            layer[f"w_hh_{d}"] = jax.random.uniform(k1, (3 * H, H), jnp.float32, -k, k)
            layer[f"b_ih_{d}"] = jax.random.uniform(k2, (3 * H,), jnp.float32, -k, k)
            layer[f"b_hh_{d}"] = jax.random.uniform(k3, (3 * H,), jnp.float32, -k, k)
        params["gru"].append(layer)

    q_in = hidden_size * num_layers * 2
    kq = 1.0 / np.sqrt(q_in)
    key, k0, k1 = jax.random.split(key, 3)
    params["qz0_w"] = jax.random.uniform(k0, (2 * latent_size, q_in), jnp.float32, -kq, kq)
    params["qz0_b"] = jax.random.uniform(k1, (2 * latent_size,), jnp.float32, -kq, kq)

    lin_in = None
    if context_mode == "full":
        lin_in = 2 * hidden_size
    elif context_mode == "constant":
        lin_in = hidden_size * num_layers * 2
    if lin_in is not None:
        kl = 1.0 / np.sqrt(lin_in)
        key, k0, k1 = jax.random.split(key, 3)
        params["lin_w"] = jax.random.uniform(k0, (context_size, lin_in), jnp.float32, -kl, kl)
        params["lin_b"] = jax.random.uniform(k1, (context_size,), jnp.float32, -kl, kl)
    return params


def _ref_gru_direction(x, w_ih, w_hh, b_ih, b_hh, reverse):
    H = w_hh.shape[1]
    xs = x[::-1] if reverse else x

    def step(h, xt):
        gi = xt @ w_ih.T + b_ih
        gh = h @ w_hh.T + b_hh
        r = jax.nn.sigmoid(gi[:, :H] + gh[:, :H])
        z = jax.nn.sigmoid(gi[:, H:2 * H] + gh[:, H:2 * H])
        n = jnp.tanh(gi[:, 2 * H:] + r * gh[:, 2 * H:])
        h_new = (1.0 - z) * n + z * h
        return h_new, h_new

    h0 = jnp.zeros((x.shape[1], H), jnp.float32)
    hfin, hseq = jax.lax.scan(step, h0, xs)
    if reverse:
        hseq = hseq[::-1]
    return hseq, hfin


def _ref_encoder(inp, params, *, num_layers, hidden_size, context_size,
                 latent_size, context_mode="full"):
    T, B, _ = inp.shape
    layer_in = inp
    fins = []
    for l in range(num_layers):
        g = params["gru"][l]
        hf_seq, hf_fin = _ref_gru_direction(
            layer_in, g["w_ih_f"], g["w_hh_f"], g["b_ih_f"], g["b_hh_f"], False)
        hb_seq, hb_fin = _ref_gru_direction(
            layer_in, g["w_ih_b"], g["w_hh_b"], g["b_ih_b"], g["b_hh_b"], True)
        layer_in = jnp.concatenate([hf_seq, hb_seq], axis=-1)
        fins.extend([hf_fin, hb_fin])
    fin_flat = jnp.stack(fins, 0).transpose(1, 0, 2).reshape(B, -1)
    qz0 = fin_flat @ params["qz0_w"].T + params["qz0_b"]
    if context_mode == "full":
        ctx = layer_in @ params["lin_w"].T + params["lin_b"]
    elif context_mode == "constant":
        c = fin_flat @ params["lin_w"].T + params["lin_b"]
        ctx = jnp.broadcast_to(c[None], (T, B, context_size))
    else:
        ctx = jnp.full((T, B, context_size), jnp.nan, jnp.float32)
    return ctx, qz0


# ---------------------------------------------------------------------------
if __name__ == "__main__":
    T, B = 8, 2
    input_size, hidden_size, context_size, latent_size = 4, 32, 8, 6
    num_layers = 2
    context_mode = "full"

    key = jax.random.PRNGKey(0)
    kp, kx = jax.random.split(key)
    params = init_params(kp, input_size, hidden_size, context_size,
                         latent_size, num_layers, context_mode)
    packed = pack_params(params, num_layers=num_layers,
                         hidden_size=hidden_size, context_mode=context_mode)
    inp = jax.random.normal(kx, (T, B, input_size), jnp.float32)

    fwd = jax.jit(lambda x, p: encoder_forward(
        x, p, num_layers=num_layers, hidden_size=hidden_size,
        context_size=context_size, latent_size=latent_size,
        context_mode=context_mode))
    ctx, qz0 = fwd(inp, packed)
    jax.block_until_ready((ctx, qz0))

    assert ctx.shape == (T, B, context_size)
    assert qz0.shape == (B, 2 * latent_size)

    ctx_ref, qz0_ref = _ref_encoder(
        inp, params, num_layers=num_layers, hidden_size=hidden_size,
        context_size=context_size, latent_size=latent_size,
        context_mode=context_mode)
    np.testing.assert_allclose(np.asarray(ctx), np.asarray(ctx_ref),
                               rtol=2e-3, atol=2e-3)
    np.testing.assert_allclose(np.asarray(qz0), np.asarray(qz0_ref),
                               rtol=2e-3, atol=2e-3)

    print("KERNEL_OK")
</pallas_src>

<mosaic_0001>
module attributes {stable_mosaic.version = 11 : i64} {
  func.func @_linear_kernel(%arg0: i32, %arg1: memref<16x4xf32, #tpu.memory_space<vmem>>, %arg2: memref<4x192xf32, #tpu.memory_space<vmem>>, %arg3: memref<1x192xf32, #tpu.memory_space<vmem>>, %arg4: memref<16x192xf32, #tpu.memory_space<vmem>>) attributes {dimension_semantics = [#tpu.dimension_semantics<parallel>], iteration_bounds = array<i64: 1>, scalar_prefetch = 0 : i64, scratch_operands = 0 : i64, tpu.core_type = #tpu.core_type<tc>, window_params = [{transform_indices = @transform_0, window_bounds = array<i64: 16, 4>}, {pipeline_mode = #tpu.pipeline_mode<synchronous>, transform_indices = @transform_1, window_bounds = array<i64: 4, 192>}, {pipeline_mode = #tpu.pipeline_mode<synchronous>, transform_indices = @transform_2, window_bounds = array<i64: 1, 192>}, {transform_indices = @transform_3, window_bounds = array<i64: 16, 192>}]} {
    %c0 = arith.constant 0 : index
    %c0_0 = arith.constant 0 : index
    %0 = vector.load %arg1[%c0, %c0_0] : memref<16x4xf32, #tpu.memory_space<vmem>>, vector<16x4xf32>
    %c0_1 = arith.constant 0 : index
    %c0_2 = arith.constant 0 : index
    %1 = vector.load %arg2[%c0_1, %c0_2] : memref<4x192xf32, #tpu.memory_space<vmem>>, vector<4x192xf32>
    %cst = arith.constant dense<0.000000e+00> : vector<16x192xf32>
    %2 = tpu.matmul %0, %1, %cst {dimension_numbers = #tpu.dot_dimension_numbers<[1], [0], [0], [1], [0, 0, 1, 1], [], []>} : vector<16x4xf32>, vector<4x192xf32>, vector<16x192xf32> -> vector<16x192xf32>
    %c0_3 = arith.constant 0 : index
    %c0_4 = arith.constant 0 : index
    %3 = vector.load %arg3[%c0_3, %c0_4] : memref<1x192xf32, #tpu.memory_space<vmem>>, vector<1x192xf32>
    %4 = vector.broadcast %3 : vector<1x192xf32> to vector<16x192xf32>
    %5 = arith.addf %2, %4 : vector<16x192xf32>
    %c0_5 = arith.constant 0 : index
    %c0_6 = arith.constant 0 : index
    %6 = vector.load %arg4[%c0_5, %c0_6] : memref<16x192xf32, #tpu.memory_space<vmem>>, vector<16x192xf32>
    tpu.vector_store %arg4[%c0_5, %c0_6], %5 {strides = array<i32>} : memref<16x192xf32, #tpu.memory_space<vmem>>, vector<16x192xf32>,
    return
  }
  func.func @transform_0(%arg0: i32) -> (i32, i32) {
    %c0_i32 = arith.constant 0 : i32
    %c0_i32_0 = arith.constant 0 : i32
    return %arg0, %c0_i32 : i32, i32
  }
  func.func @transform_1(%arg0: i32) -> (i32, i32) {
    %c0_i32 = arith.constant 0 : i32
    %c0_i32_0 = arith.constant 0 : i32
    %c0_i32_1 = arith.constant 0 : i32
    return %c0_i32, %c0_i32_0 : i32, i32
  }
  func.func @transform_2(%arg0: i32) -> (i32, i32) {
    %c0_i32 = arith.constant 0 : i32
    %c0_i32_0 = arith.constant 0 : i32
    %c0_i32_1 = arith.constant 0 : i32
    return %c0_i32, %c0_i32_0 : i32, i32
  }
  func.func @transform_3(%arg0: i32) -> (i32, i32) {
    %c0_i32 = arith.constant 0 : i32
    %c0_i32_0 = arith.constant 0 : i32
    return %arg0, %c0_i32 : i32, i32
  }
}

module attributes {stable_mosaic.version = 11 : i64} {
  func.func @_bigru_kernel(%arg0: i32, %arg1: memref<8x2x192xf32, #tpu.memory_space<vmem>>, %arg2: memref<64x192xf32, #tpu.memory_space<vmem>>, %arg3: memref<1x192xf32, #tpu.memory_space<vmem>>, %arg4: memref<8x2x64xf32, #tpu.memory_space<vmem>>, %arg5: memref<2x64xf32, #tpu.memory_space<vmem>>) attributes {dimension_semantics = [#tpu.dimension_semantics<arbitrary>], iteration_bounds = array<i64: 1>, scalar_prefetch = 0 : i64, scratch_operands = 1 : i64, tpu.core_type = #tpu.core_type<tc>, window_params = [{transform_indices = @transform_0, window_bounds = array<i64: 8, 2, 192>}, {pipeline_mode = #tpu.pipeline_mode<synchronous>, transform_indices = @transform_1, window_bounds = array<i64: 64, 192>}, {pipeline_mode = #tpu.pipeline_mode<synchronous>, transform_indices = @transform_2, window_bounds = array<i64: 1, 192>}, {transform_indices = @transform_3, window_bounds = array<i64: 8, 2, 64>}]} {
    %c0_i32 = arith.constant 0 : i32
    %0 = arith.cmpi eq, %arg0, %c0_i32 : i32
    %1 = arith.extui %0 : i1 to i32
    %c0_i32_0 = arith.constant 0 : i32
    %2 = arith.cmpi ne, %1, %c0_i32_0 : i32
    scf.if %2 {
      %cst_72 = arith.constant 0.000000e+00 : f32
      %295 = vector.broadcast %cst_72 : f32 to vector<2x64xf32>
      %c0_73 = arith.constant 0 : index
      %c0_74 = arith.constant 0 : index
      %296 = vector.load %arg5[%c0_73, %c0_74] : memref<2x64xf32, #tpu.memory_space<vmem>>, vector<2x64xf32>
      tpu.vector_store %arg5[%c0_73, %c0_74], %295 {strides = array<i32>} : memref<2x64xf32, #tpu.memory_space<vmem>>, vector<2x64xf32>,
    } else {
    }
    %c0 = arith.constant 0 : index
    %c0_1 = arith.constant 0 : index
    %3 = vector.load %arg2[%c0, %c0_1] : memref<64x192xf32, #tpu.memory_space<vmem>>, vector<64x192xf32>
    %c0_2 = arith.constant 0 : index
    %c0_3 = arith.constant 0 : index
    %4 = vector.load %arg3[%c0_2, %c0_3] : memref<1x192xf32, #tpu.memory_space<vmem>>, vector<1x192xf32>
    %c0_4 = arith.constant 0 : index
    %c0_5 = arith.constant 0 : index
    %5 = vector.load %arg5[%c0_4, %c0_5] : memref<2x64xf32, #tpu.memory_space<vmem>>, vector<2x64xf32>
    %c0_i32_6 = arith.constant 0 : i32
    %6 = arith.index_cast %c0_i32_6 : i32 to index
    %c0_7 = arith.constant 0 : index
    %c0_8 = arith.constant 0 : index
    %7 = vector.load %arg1[%6, %c0_7, %c0_8] : memref<8x2x192xf32, #tpu.memory_space<vmem>>, vector<1x2x192xf32>
    %8 = vector.shape_cast %7 : vector<1x2x192xf32> to vector<2x192xf32>
    %cst = arith.constant dense<0.000000e+00> : vector<2x192xf32>
    %9 = tpu.matmul %5, %3, %cst {dimension_numbers = #tpu.dot_dimension_numbers<[1], [0], [0], [1], [0, 0, 1, 1], [], []>} : vector<2x64xf32>, vector<64x192xf32>, vector<2x192xf32> -> vector<2x192xf32>
    %10 = vector.broadcast %4 : vector<1x192xf32> to vector<2x192xf32>
    %11 = arith.addf %9, %10 : vector<2x192xf32>
    %12 = vector.extract_strided_slice %8 {offsets = [0, 0], sizes = [2, 64], strides = [1, 1]} : vector<2x192xf32> to vector<2x64xf32>
    %13 = vector.extract_strided_slice %11 {offsets = [0, 0], sizes = [2, 64], strides = [1, 1]} : vector<2x192xf32> to vector<2x64xf32>
    %14 = arith.addf %12, %13 : vector<2x64xf32>
    %15 = arith.negf %14 : vector<2x64xf32>
    %16 = math.exp %15 : vector<2x64xf32>
    %cst_9 = arith.constant 1.000000e+00 : f32
    %17 = vector.broadcast %cst_9 : f32 to vector<2x64xf32>
    %18 = arith.addf %17, %16 : vector<2x64xf32>
    %19 = arith.divf %17, %18 : vector<2x64xf32>
    %20 = vector.extract_strided_slice %8 {offsets = [0, 64], sizes = [2, 64], strides = [1, 1]} : vector<2x192xf32> to vector<2x64xf32>
    %21 = vector.extract_strided_slice %11 {offsets = [0, 64], sizes = [2, 64], strides = [1, 1]} : vector<2x192xf32> to vector<2x64xf32>
    %22 = arith.addf %20, %21 : vector<2x64xf32>
    %23 = arith.negf %22 : vector<2x64xf32>
    %24 = math.exp %23 : vector<2x64xf32>
    %cst_10 = arith.constant 1.000000e+00 : f32
    %25 = vector.broadcast %cst_10 : f32 to vector<2x64xf32>
    %26 = arith.addf %25, %24 : vector<2x64xf32>
    %27 = arith.divf %25, %26 : vector<2x64xf32>
    %28 = vector.extract_strided_slice %8 {offsets = [0, 128], sizes = [2, 64], strides = [1, 1]} : vector<2x192xf32> to vector<2x64xf32>
    %29 = vector.extract_strided_slice %11 {offsets = [0, 128], sizes = [2, 64], strides = [1, 1]} : vector<2x192xf32> to vector<2x64xf32>
    %30 = arith.mulf %19, %29 : vector<2x64xf32>
    %31 = arith.addf %28, %30 : vector<2x64xf32>
    %32 = math.tanh %31 : vector<2x64xf32>
    %cst_11 = arith.constant 1.000000e+00 : f32
    %33 = vector.broadcast %cst_11 : f32 to vector<2x64xf32>
    %34 = arith.subf %33, %27 : vector<2x64xf32>
    %35 = arith.mulf %34, %32 : vector<2x64xf32>
    %36 = arith.mulf %27, %5 : vector<2x64xf32>
    %37 = arith.addf %35, %36 : vector<2x64xf32>
    %38 = arith.index_cast %c0_i32_6 : i32 to index
    %c0_12 = arith.constant 0 : index
    %c0_13 = arith.constant 0 : index
    %39 = vector.load %arg4[%38, %c0_12, %c0_13] : memref<8x2x64xf32, #tpu.memory_space<vmem>>, vector<1x2x64xf32>
    %40 = vector.shape_cast %39 : vector<1x2x64xf32> to vector<2x64xf32>
    %41 = vector.shape_cast %37 : vector<2x64xf32> to vector<1x2x64xf32>
    tpu.vector_store %arg4[%38, %c0_12, %c0_13], %41 {strides = array<i32>} : memref<8x2x64xf32, #tpu.memory_space<vmem>>, vector<1x2x64xf32>,
    %c1_i32 = arith.constant 1 : i32
    %42 = arith.index_cast %c1_i32 : i32 to index
    %c0_14 = arith.constant 0 : index
    %c0_15 = arith.constant 0 : index
    %43 = vector.load %arg1[%42, %c0_14, %c0_15] : memref<8x2x192xf32, #tpu.memory_space<vmem>>, vector<1x2x192xf32>
    %44 = vector.shape_cast %43 : vector<1x2x192xf32> to vector<2x192xf32>
    %cst_16 = arith.constant dense<0.000000e+00> : vector<2x192xf32>
    %45 = tpu.matmul %37, %3, %cst_16 {dimension_numbers = #tpu.dot_dimension_numbers<[1], [0], [0], [1], [0, 0, 1, 1], [], []>} : vector<2x64xf32>, vector<64x192xf32>, vector<2x192xf32> -> vector<2x192xf32>
    %46 = vector.broadcast %4 : vector<1x192xf32> to vector<2x192xf32>
    %47 = arith.addf %45, %46 : vector<2x192xf32>
    %48 = vector.extract_strided_slice %44 {offsets = [0, 0], sizes = [2, 64], strides = [1, 1]} : vector<2x192xf32> to vector<2x64xf32>
    %49 = vector.extract_strided_slice %47 {offsets = [0, 0], sizes = [2, 64], strides = [1, 1]} : vector<2x192xf32> to vector<2x64xf32>
    %50 = arith.addf %48, %49 : vector<2x64xf32>
    %51 = arith.negf %50 : vector<2x64xf32>
    %52 = math.exp %51 : vector<2x64xf32>
    %cst_17 = arith.constant 1.000000e+00 : f32
    %53 = vector.broadcast %cst_17 : f32 to vector<2x64xf32>
    %54 = arith.addf %53, %52 : vector<2x64xf32>
    %55 = arith.divf %53, %54 : vector<2x64xf32>
    %56 = vector.extract_strided_slice %44 {offsets = [0, 64], sizes = [2, 64], strides = [1, 1]} : vector<2x192xf32> to vector<2x64xf32>
    %57 = vector.extract_strided_slice %47 {offsets = [0, 64], sizes = [2, 64], strides = [1, 1]} : vector<2x192xf32> to vector<2x64xf32>
    %58 = arith.addf %56, %57 : vector<2x64xf32>
    %59 = arith.negf %58 : vector<2x64xf32>
    %60 = math.exp %59 : vector<2x64xf32>
    %cst_18 = arith.constant 1.000000e+00 : f32
    %61 = vector.broadcast %cst_18 : f32 to vector<2x64xf32>
    %62 = arith.addf %61, %60 : vector<2x64xf32>
    %63 = arith.divf %61, %62 : vector<2x64xf32>
    %64 = vector.extract_strided_slice %44 {offsets = [0, 128], sizes = [2, 64], strides = [1, 1]} : vector<2x192xf32> to vector<2x64xf32>
    %65 = vector.extract_strided_slice %47 {offsets = [0, 128], sizes = [2, 64], strides = [1, 1]} : vector<2x192xf32> to vector<2x64xf32>
    %66 = arith.mulf %55, %65 : vector<2x64xf32>
    %67 = arith.addf %64, %66 : vector<2x64xf32>
    %68 = math.tanh %67 : vector<2x64xf32>
    %cst_19 = arith.constant 1.000000e+00 : f32
    %69 = vector.broadcast %cst_19 : f32 to vector<2x64xf32>
    %70 = arith.subf %69, %63 : vector<2x64xf32>
    %71 = arith.mulf %70, %68 : vector<2x64xf32>
    %72 = arith.mulf %63, %37 : vector<2x64xf32>
    %73 = arith.addf %71, %72 : vector<2x64xf32>
    %74 = arith.index_cast %c1_i32 : i32 to index
    %c0_20 = arith.constant 0 : index
    %c0_21 = arith.constant 0 : index
    %75 = vector.load %arg4[%74, %c0_20, %c0_21] : memref<8x2x64xf32, #tpu.memory_space<vmem>>, vector<1x2x64xf32>
    %76 = vector.shape_cast %75 : vector<1x2x64xf32> to vector<2x64xf32>
    %77 = vector.shape_cast %73 : vector<2x64xf32> to vector<1x2x64xf32>
    tpu.vector_store %arg4[%74, %c0_20, %c0_21], %77 {strides = array<i32>} : memref<8x2x64xf32, #tpu.memory_space<vmem>>, vector<1x2x64xf32>,
    %c2_i32 = arith.constant 2 : i32
    %78 = arith.index_cast %c2_i32 : i32 to index
    %c0_22 = arith.constant 0 : index
    %c0_23 = arith.constant 0 : index
    %79 = vector.load %arg1[%78, %c0_22, %c0_23] : memref<8x2x192xf32, #tpu.memory_space<vmem>>, vector<1x2x192xf32>
    %80 = vector.shape_cast %79 : vector<1x2x192xf32> to vector<2x192xf32>
    %cst_24 = arith.constant dense<0.000000e+00> : vector<2x192xf32>
    %81 = tpu.matmul %73, %3, %cst_24 {dimension_numbers = #tpu.dot_dimension_numbers<[1], [0], [0], [1], [0, 0, 1, 1], [], []>} : vector<2x64xf32>, vector<64x192xf32>, vector<2x192xf32> -> vector<2x192xf32>
    %82 = vector.broadcast %4 : vector<1x192xf32> to vector<2x192xf32>
    %83 = arith.addf %81, %82 : vector<2x192xf32>
    %84 = vector.extract_strided_slice %80 {offsets = [0, 0], sizes = [2, 64], strides = [1, 1]} : vector<2x192xf32> to vector<2x64xf32>
    %85 = vector.extract_strided_slice %83 {offsets = [0, 0], sizes = [2, 64], strides = [1, 1]} : vector<2x192xf32> to vector<2x64xf32>
    %86 = arith.addf %84, %85 : vector<2x64xf32>
    %87 = arith.negf %86 : vector<2x64xf32>
    %88 = math.exp %87 : vector<2x64xf32>
    %cst_25 = arith.constant 1.000000e+00 : f32
    %89 = vector.broadcast %cst_25 : f32 to vector<2x64xf32>
    %90 = arith.addf %89, %88 : vector<2x64xf32>
    %91 = arith.divf %89, %90 : vector<2x64xf32>
    %92 = vector.extract_strided_slice %80 {offsets = [0, 64], sizes = [2, 64], strides = [1, 1]} : vector<2x192xf32> to vector<2x64xf32>
    %93 = vector.extract_strided_slice %83 {offsets = [0, 64], sizes = [2, 64], strides = [1, 1]} : vector<2x192xf32> to vector<2x64xf32>
    %94 = arith.addf %92, %93 : vector<2x64xf32>
    %95 = arith.negf %94 : vector<2x64xf32>
    %96 = math.exp %95 : vector<2x64xf32>
    %cst_26 = arith.constant 1.000000e+00 : f32
    %97 = vector.broadcast %cst_26 : f32 to vector<2x64xf32>
    %98 = arith.addf %97, %96 : vector<2x64xf32>
    %99 = arith.divf %97, %98 : vector<2x64xf32>
    %100 = vector.extract_strided_slice %80 {offsets = [0, 128], sizes = [2, 64], strides = [1, 1]} : vector<2x192xf32> to vector<2x64xf32>
    %101 = vector.extract_strided_slice %83 {offsets = [0, 128], sizes = [2, 64], strides = [1, 1]} : vector<2x192xf32> to vector<2x64xf32>
    %102 = arith.mulf %91, %101 : vector<2x64xf32>
    %103 = arith.addf %100, %102 : vector<2x64xf32>
    %104 = math.tanh %103 : vector<2x64xf32>
    %cst_27 = arith.constant 1.000000e+00 : f32
    %105 = vector.broadcast %cst_27 : f32 to vector<2x64xf32>
    %106 = arith.subf %105, %99 : vector<2x64xf32>
    %107 = arith.mulf %106, %104 : vector<2x64xf32>
    %108 = arith.mulf %99, %73 : vector<2x64xf32>
    %109 = arith.addf %107, %108 : vector<2x64xf32>
    %110 = arith.index_cast %c2_i32 : i32 to index
    %c0_28 = arith.constant 0 : index
    %c0_29 = arith.constant 0 : index
    %111 = vector.load %arg4[%110, %c0_28, %c0_29] : memref<8x2x64xf32, #tpu.memory_space<vmem>>, vector<1x2x64xf32>
    %112 = vector.shape_cast %111 : vector<1x2x64xf32> to vector<2x64xf32>
    %113 = vector.shape_cast %109 : vector<2x64xf32> to vector<1x2x64xf32>
    tpu.vector_store %arg4[%110, %c0_28, %c0_29], %113 {strides = array<i32>} : memref<8x2x64xf32, #tpu.memory_space<vmem>>, vector<1x2x64xf32>,
    %c3_i32 = arith.constant 3 : i32
    %114 = arith.index_cast %c3_i32 : i32 to index
    %c0_30 = arith.constant 0 : index
    %c0_31 = arith.constant 0 : index
    %115 = vector.load %arg1[%114, %c0_30, %c0_31] : memref<8x2x192xf32, #tpu.memory_space<vmem>>, vector<1x2x192xf32>
    %116 = vector.shape_cast %115 : vector<1x2x192xf32> to vector<2x192xf32>
    %cst_32 = arith.constant dense<0.000000e+00> : vector<2x192xf32>
    %117 = tpu.matmul %109, %3, %cst_32 {dimension_numbers = #tpu.dot_dimension_numbers<[1], [0], [0], [1], [0, 0, 1, 1], [], []>} : vector<2x64xf32>, vector<64x192xf32>, vector<2x192xf32> -> vector<2x192xf32>
    %118 = vector.broadcast %4 : vector<1x192xf32> to vector<2x192xf32>
    %119 = arith.addf %117, %118 : vector<2x192xf32>
    %120 = vector.extract_strided_slice %116 {offsets = [0, 0], sizes = [2, 64], strides = [1, 1]} : vector<2x192xf32> to vector<2x64xf32>
    %121 = vector.extract_strided_slice %119 {offsets = [0, 0], sizes = [2, 64], strides = [1, 1]} : vector<2x192xf32> to vector<2x64xf32>
    %122 = arith.addf %120, %121 : vector<2x64xf32>
    %123 = arith.negf %122 : vector<2x64xf32>
    %124 = math.exp %123 : vector<2x64xf32>
    %cst_33 = arith.constant 1.000000e+00 : f32
    %125 = vector.broadcast %cst_33 : f32 to vector<2x64xf32>
    %126 = arith.addf %125, %124 : vector<2x64xf32>
    %127 = arith.divf %125, %126 : vector<2x64xf32>
    %128 = vector.extract_strided_slice %116 {offsets = [0, 64], sizes = [2, 64], strides = [1, 1]} : vector<2x192xf32> to vector<2x64xf32>
    %129 = vector.extract_strided_slice %119 {offsets = [0, 64], sizes = [2, 64], strides = [1, 1]} : vector<2x192xf32> to vector<2x64xf32>
    %130 = arith.addf %128, %129 : vector<2x64xf32>
    %131 = arith.negf %130 : vector<2x64xf32>
    %132 = math.exp %131 : vector<2x64xf32>
    %cst_34 = arith.constant 1.000000e+00 : f32
    %133 = vector.broadcast %cst_34 : f32 to vector<2x64xf32>
    %134 = arith.addf %133, %132 : vector<2x64xf32>
    %135 = arith.divf %133, %134 : vector<2x64xf32>
    %136 = vector.extract_strided_slice %116 {offsets = [0, 128], sizes = [2, 64], strides = [1, 1]} : vector<2x192xf32> to vector<2x64xf32>
    %137 = vector.extract_strided_slice %119 {offsets = [0, 128], sizes = [2, 64], strides = [1, 1]} : vector<2x192xf32> to vector<2x64xf32>
    %138 = arith.mulf %127, %137 : vector<2x64xf32>
    %139 = arith.addf %136, %138 : vector<2x64xf32>
    %140 = math.tanh %139 : vector<2x64xf32>
    %cst_35 = arith.constant 1.000000e+00 : f32
    %141 = vector.broadcast %cst_35 : f32 to vector<2x64xf32>
    %142 = arith.subf %141, %135 : vector<2x64xf32>
    %143 = arith.mulf %142, %140 : vector<2x64xf32>
    %144 = arith.mulf %135, %109 : vector<2x64xf32>
    %145 = arith.addf %143, %144 : vector<2x64xf32>
    %146 = arith.index_cast %c3_i32 : i32 to index
    %c0_36 = arith.constant 0 : index
    %c0_37 = arith.constant 0 : index
    %147 = vector.load %arg4[%146, %c0_36, %c0_37] : memref<8x2x64xf32, #tpu.memory_space<vmem>>, vector<1x2x64xf32>
    %148 = vector.shape_cast %147 : vector<1x2x64xf32> to vector<2x64xf32>
    %149 = vector.shape_cast %145 : vector<2x64xf32> to vector<1x2x64xf32>
    tpu.vector_store %arg4[%146, %c0_36, %c0_37], %149 {strides = array<i32>} : memref<8x2x64xf32, #tpu.memory_space<vmem>>, vector<1x2x64xf32>,
    %c4_i32 = arith.constant 4 : i32
    %150 = arith.index_cast %c4_i32 : i32 to index
    %c0_38 = arith.constant 0 : index
    %c0_39 = arith.constant 0 : index
    %151 = vector.load %arg1[%150, %c0_38, %c0_39] : memref<8x2x192xf32, #tpu.memory_space<vmem>>, vector<1x2x192xf32>
    %152 = vector.shape_cast %151 : vector<1x2x192xf32> to vector<2x192xf32>
    %cst_40 = arith.constant dense<0.000000e+00> : vector<2x192xf32>
    %153 = tpu.matmul %145, %3, %cst_40 {dimension_numbers = #tpu.dot_dimension_numbers<[1], [0], [0], [1], [0, 0, 1, 1], [], []>} : vector<2x64xf32>, vector<64x192xf32>, vector<2x192xf32> -> vector<2x192xf32>
    %154 = vector.broadcast %4 : vector<1x192xf32> to vector<2x192xf32>
    %155 = arith.addf %153, %154 : vector<2x192xf32>
    %156 = vector.extract_strided_slice %152 {offsets = [0, 0], sizes = [2, 64], strides = [1, 1]} : vector<2x192xf32> to vector<2x64xf32>
    %157 = vector.extract_strided_slice %155 {offsets = [0, 0], sizes = [2, 64], strides = [1, 1]} : vector<2x192xf32> to vector<2x64xf32>
    %158 = arith.addf %156, %157 : vector<2x64xf32>
    %159 = arith.negf %158 : vector<2x64xf32>
    %160 = math.exp %159 : vector<2x64xf32>
    %cst_41 = arith.constant 1.000000e+00 : f32
    %161 = vector.broadcast %cst_41 : f32 to vector<2x64xf32>
    %162 = arith.addf %161, %160 : vector<2x64xf32>
    %163 = arith.divf %161, %162 : vector<2x64xf32>
    %164 = vector.extract_strided_slice %152 {offsets = [0, 64], sizes = [2, 64], strides = [1, 1]} : vector<2x192xf32> to vector<2x64xf32>
    %165 = vector.extract_strided_slice %155 {offsets = [0, 64], sizes = [2, 64], strides = [1, 1]} : vector<2x192xf32> to vector<2x64xf32>
    %166 = arith.addf %164, %165 : vector<2x64xf32>
    %167 = arith.negf %166 : vector<2x64xf32>
    %168 = math.exp %167 : vector<2x64xf32>
    %cst_42 = arith.constant 1.000000e+00 : f32
    %169 = vector.broadcast %cst_42 : f32 to vector<2x64xf32>
    %170 = arith.addf %169, %168 : vector<2x64xf32>
    %171 = arith.divf %169, %170 : vector<2x64xf32>
    %172 = vector.extract_strided_slice %152 {offsets = [0, 128], sizes = [2, 64], strides = [1, 1]} : vector<2x192xf32> to vector<2x64xf32>
    %173 = vector.extract_strided_slice %155 {offsets = [0, 128], sizes = [2, 64], strides = [1, 1]} : vector<2x192xf32> to vector<2x64xf32>
    %174 = arith.mulf %163, %173 : vector<2x64xf32>
    %175 = arith.addf %172, %174 : vector<2x64xf32>
    %176 = math.tanh %175 : vector<2x64xf32>
    %cst_43 = arith.constant 1.000000e+00 : f32
    %177 = vector.broadcast %cst_43 : f32 to vector<2x64xf32>
    %178 = arith.subf %177, %171 : vector<2x64xf32>
    %179 = arith.mulf %178, %176 : vector<2x64xf32>
    %180 = arith.mulf %171, %145 : vector<2x64xf32>
    %181 = arith.addf %179, %180 : vector<2x64xf32>
    %182 = arith.index_cast %c4_i32 : i32 to index
    %c0_44 = arith.constant 0 : index
    %c0_45 = arith.constant 0 : index
    %183 = vector.load %arg4[%182, %c0_44, %c0_45] : memref<8x2x64xf32, #tpu.memory_space<vmem>>, vector<1x2x64xf32>
    %184 = vector.shape_cast %183 : vector<1x2x64xf32> to vector<2x64xf32>
    %185 = vector.shape_cast %181 : vector<2x64xf32> to vector<1x2x64xf32>
    tpu.vector_store %arg4[%182, %c0_44, %c0_45], %185 {strides = array<i32>} : memref<8x2x64xf32, #tpu.memory_space<vmem>>, vector<1x2x64xf32>,
    %c5_i32 = arith.constant 5 : i32
    %186 = arith.index_cast %c5_i32 : i32 to index
    %c0_46 = arith.constant 0 : index
    %c0_47 = arith.constant 0 : index
    %187 = vector.load %arg1[%186, %c0_46, %c0_47] : memref<8x2x192xf32, #tpu.memory_space<vmem>>, vector<1x2x192xf32>
    %188 = vector.shape_cast %187 : vector<1x2x192xf32> to vector<2x192xf32>
    %cst_48 = arith.constant dense<0.000000e+00> : vector<2x192xf32>
    %189 = tpu.matmul %181, %3, %cst_48 {dimension_numbers = #tpu.dot_dimension_numbers<[1], [0], [0], [1], [0, 0, 1, 1], [], []>} : vector<2x64xf32>, vector<64x192xf32>, vector<2x192xf32> -> vector<2x192xf32>
    %190 = vector.broadcast %4 : vector<1x192xf32> to vector<2x192xf32>
    %191 = arith.addf %189, %190 : vector<2x192xf32>
    %192 = vector.extract_strided_slice %188 {offsets = [0, 0], sizes = [2, 64], strides = [1, 1]} : vector<2x192xf32> to vector<2x64xf32>
    %193 = vector.extract_strided_slice %191 {offsets = [0, 0], sizes = [2, 64], strides = [1, 1]} : vector<2x192xf32> to vector<2x64xf32>
    %194 = arith.addf %192, %193 : vector<2x64xf32>
    %195 = arith.negf %194 : vector<2x64xf32>
    %196 = math.exp %195 : vector<2x64xf32>
    %cst_49 = arith.constant 1.000000e+00 : f32
    %197 = vector.broadcast %cst_49 : f32 to vector<2x64xf32>
    %198 = arith.addf %197, %196 : vector<2x64xf32>
    %199 = arith.divf %197, %198 : vector<2x64xf32>
    %200 = vector.extract_strided_slice %188 {offsets = [0, 64], sizes = [2, 64], strides = [1, 1]} : vector<2x192xf32> to vector<2x64xf32>
    %201 = vector.extract_strided_slice %191 {offsets = [0, 64], sizes = [2, 64], strides = [1, 1]} : vector<2x192xf32> to vector<2x64xf32>
    %202 = arith.addf %200, %201 : vector<2x64xf32>
    %203 = arith.negf %202 : vector<2x64xf32>
    %204 = math.exp %203 : vector<2x64xf32>
    %cst_50 = arith.constant 1.000000e+00 : f32
    %205 = vector.broadcast %cst_50 : f32 to vector<2x64xf32>
    %206 = arith.addf %205, %204 : vector<2x64xf32>
    %207 = arith.divf %205, %206 : vector<2x64xf32>
    %208 = vector.extract_strided_slice %188 {offsets = [0, 128], sizes = [2, 64], strides = [1, 1]} : vector<2x192xf32> to vector<2x64xf32>
    %209 = vector.extract_strided_slice %191 {offsets = [0, 128], sizes = [2, 64], strides = [1, 1]} : vector<2x192xf32> to vector<2x64xf32>
    %210 = arith.mulf %199, %209 : vector<2x64xf32>
    %211 = arith.addf %208, %210 : vector<2x64xf32>
    %212 = math.tanh %211 : vector<2x64xf32>
    %cst_51 = arith.constant 1.000000e+00 : f32
    %213 = vector.broadcast %cst_51 : f32 to vector<2x64xf32>
    %214 = arith.subf %213, %207 : vector<2x64xf32>
    %215 = arith.mulf %214, %212 : vector<2x64xf32>
    %216 = arith.mulf %207, %181 : vector<2x64xf32>
    %217 = arith.addf %215, %216 : vector<2x64xf32>
    %218 = arith.index_cast %c5_i32 : i32 to index
    %c0_52 = arith.constant 0 : index
    %c0_53 = arith.constant 0 : index
    %219 = vector.load %arg4[%218, %c0_52, %c0_53] : memref<8x2x64xf32, #tpu.memory_space<vmem>>, vector<1x2x64xf32>
    %220 = vector.shape_cast %219 : vector<1x2x64xf32> to vector<2x64xf32>
    %221 = vector.shape_cast %217 : vector<2x64xf32> to vector<1x2x64xf32>
    tpu.vector_store %arg4[%218, %c0_52, %c0_53], %221 {strides = array<i32>} : memref<8x2x64xf32, #tpu.memory_space<vmem>>, vector<1x2x64xf32>,
    %c6_i32 = arith.constant 6 : i32
    %222 = arith.index_cast %c6_i32 : i32 to index
    %c0_54 = arith.constant 0 : index
    %c0_55 = arith.constant 0 : index
    %223 = vector.load %arg1[%222, %c0_54, %c0_55] : memref<8x2x192xf32, #tpu.memory_space<vmem>>, vector<1x2x192xf32>
    %224 = vector.shape_cast %223 : vector<1x2x192xf32> to vector<2x192xf32>
    %cst_56 = arith.constant dense<0.000000e+00> : vector<2x192xf32>
    %225 = tpu.matmul %217, %3, %cst_56 {dimension_numbers = #tpu.dot_dimension_numbers<[1], [0], [0], [1], [0, 0, 1, 1], [], []>} : vector<2x64xf32>, vector<64x192xf32>, vector<2x192xf32> -> vector<2x192xf32>
    %226 = vector.broadcast %4 : vector<1x192xf32> to vector<2x192xf32>
    %227 = arith.addf %225, %226 : vector<2x192xf32>
    %228 = vector.extract_strided_slice %224 {offsets = [0, 0], sizes = [2, 64], strides = [1, 1]} : vector<2x192xf32> to vector<2x64xf32>
    %229 = vector.extract_strided_slice %227 {offsets = [0, 0], sizes = [2, 64], strides = [1, 1]} : vector<2x192xf32> to vector<2x64xf32>
    %230 = arith.addf %228, %229 : vector<2x64xf32>
    %231 = arith.negf %230 : vector<2x64xf32>
    %232 = math.exp %231 : vector<2x64xf32>
    %cst_57 = arith.constant 1.000000e+00 : f32
    %233 = vector.broadcast %cst_57 : f32 to vector<2x64xf32>
    %234 = arith.addf %233, %232 : vector<2x64xf32>
    %235 = arith.divf %233, %234 : vector<2x64xf32>
    %236 = vector.extract_strided_slice %224 {offsets = [0, 64], sizes = [2, 64], strides = [1, 1]} : vector<2x192xf32> to vector<2x64xf32>
    %237 = vector.extract_strided_slice %227 {offsets = [0, 64], sizes = [2, 64], strides = [1, 1]} : vector<2x192xf32> to vector<2x64xf32>
    %238 = arith.addf %236, %237 : vector<2x64xf32>
    %239 = arith.negf %238 : vector<2x64xf32>
    %240 = math.exp %239 : vector<2x64xf32>
    %cst_58 = arith.constant 1.000000e+00 : f32
    %241 = vector.broadcast %cst_58 : f32 to vector<2x64xf32>
    %242 = arith.addf %241, %240 : vector<2x64xf32>
    %243 = arith.divf %241, %242 : vector<2x64xf32>
    %244 = vector.extract_strided_slice %224 {offsets = [0, 128], sizes = [2, 64], strides = [1, 1]} : vector<2x192xf32> to vector<2x64xf32>
    %245 = vector.extract_strided_slice %227 {offsets = [0, 128], sizes = [2, 64], strides = [1, 1]} : vector<2x192xf32> to vector<2x64xf32>
    %246 = arith.mulf %235, %245 : vector<2x64xf32>
    %247 = arith.addf %244, %246 : vector<2x64xf32>
    %248 = math.tanh %247 : vector<2x64xf32>
    %cst_59 = arith.constant 1.000000e+00 : f32
    %249 = vector.broadcast %cst_59 : f32 to vector<2x64xf32>
    %250 = arith.subf %249, %243 : vector<2x64xf32>
    %251 = arith.mulf %250, %248 : vector<2x64xf32>
    %252 = arith.mulf %243, %217 : vector<2x64xf32>
    %253 = arith.addf %251, %252 : vector<2x64xf32>
    %254 = arith.index_cast %c6_i32 : i32 to index
    %c0_60 = arith.constant 0 : index
    %c0_61 = arith.constant 0 : index
    %255 = vector.load %arg4[%254, %c0_60, %c0_61] : memref<8x2x64xf32, #tpu.memory_space<vmem>>, vector<1x2x64xf32>
    %256 = vector.shape_cast %255 : vector<1x2x64xf32> to vector<2x64xf32>
    %257 = vector.shape_cast %253 : vector<2x64xf32> to vector<1x2x64xf32>
    tpu.vector_store %arg4[%254, %c0_60, %c0_61], %257 {strides = array<i32>} : memref<8x2x64xf32, #tpu.memory_space<vmem>>, vector<1x2x64xf32>,
    %c7_i32 = arith.constant 7 : i32
    %258 = arith.index_cast %c7_i32 : i32 to index
    %c0_62 = arith.constant 0 : index
    %c0_63 = arith.constant 0 : index
    %259 = vector.load %arg1[%258, %c0_62, %c0_63] : memref<8x2x192xf32, #tpu.memory_space<vmem>>, vector<1x2x192xf32>
    %260 = vector.shape_cast %259 : vector<1x2x192xf32> to vector<2x192xf32>
    %cst_64 = arith.constant dense<0.000000e+00> : vector<2x192xf32>
    %261 = tpu.matmul %253, %3, %cst_64 {dimension_numbers = #tpu.dot_dimension_numbers<[1], [0], [0], [1], [0, 0, 1, 1], [], []>} : vector<2x64xf32>, vector<64x192xf32>, vector<2x192xf32> -> vector<2x192xf32>
    %262 = vector.broadcast %4 : vector<1x192xf32> to vector<2x192xf32>
    %263 = arith.addf %261, %262 : vector<2x192xf32>
    %264 = vector.extract_strided_slice %260 {offsets = [0, 0], sizes = [2, 64], strides = [1, 1]} : vector<2x192xf32> to vector<2x64xf32>
    %265 = vector.extract_strided_slice %263 {offsets = [0, 0], sizes = [2, 64], strides = [1, 1]} : vector<2x192xf32> to vector<2x64xf32>
    %266 = arith.addf %264, %265 : vector<2x64xf32>
    %267 = arith.negf %266 : vector<2x64xf32>
    %268 = math.exp %267 : vector<2x64xf32>
    %cst_65 = arith.constant 1.000000e+00 : f32
    %269 = vector.broadcast %cst_65 : f32 to vector<2x64xf32>
    %270 = arith.addf %269, %268 : vector<2x64xf32>
    %271 = arith.divf %269, %270 : vector<2x64xf32>
    %272 = vector.extract_strided_slice %260 {offsets = [0, 64], sizes = [2, 64], strides = [1, 1]} : vector<2x192xf32> to vector<2x64xf32>
    %273 = vector.extract_strided_slice %263 {offsets = [0, 64], sizes = [2, 64], strides = [1, 1]} : vector<2x192xf32> to vector<2x64xf32>
    %274 = arith.addf %272, %273 : vector<2x64xf32>
    %275 = arith.negf %274 : vector<2x64xf32>
    %276 = math.exp %275 : vector<2x64xf32>
    %cst_66 = arith.constant 1.000000e+00 : f32
    %277 = vector.broadcast %cst_66 : f32 to vector<2x64xf32>
    %278 = arith.addf %277, %276 : vector<2x64xf32>
    %279 = arith.divf %277, %278 : vector<2x64xf32>
    %280 = vector.extract_strided_slice %260 {offsets = [0, 128], sizes = [2, 64], strides = [1, 1]} : vector<2x192xf32> to vector<2x64xf32>
    %281 = vector.extract_strided_slice %263 {offsets = [0, 128], sizes = [2, 64], strides = [1, 1]} : vector<2x192xf32> to vector<2x64xf32>
    %282 = arith.mulf %271, %281 : vector<2x64xf32>
    %283 = arith.addf %280, %282 : vector<2x64xf32>
    %284 = math.tanh %283 : vector<2x64xf32>
    %cst_67 = arith.constant 1.000000e+00 : f32
    %285 = vector.broadcast %cst_67 : f32 to vector<2x64xf32>
    %286 = arith.subf %285, %279 : vector<2x64xf32>
    %287 = arith.mulf %286, %284 : vector<2x64xf32>
    %288 = arith.mulf %279, %253 : vector<2x64xf32>
    %289 = arith.addf %287, %288 : vector<2x64xf32>
    %290 = arith.index_cast %c7_i32 : i32 to index
    %c0_68 = arith.constant 0 : index
    %c0_69 = arith.constant 0 : index
    %291 = vector.load %arg4[%290, %c0_68, %c0_69] : memref<8x2x64xf32, #tpu.memory_space<vmem>>, vector<1x2x64xf32>
    %292 = vector.shape_cast %291 : vector<1x2x64xf32> to vector<2x64xf32>
    %293 = vector.shape_cast %289 : vector<2x64xf32> to vector<1x2x64xf32>
    tpu.vector_store %arg4[%290, %c0_68, %c0_69], %293 {strides = array<i32>} : memref<8x2x64xf32, #tpu.memory_space<vmem>>, vector<1x2x64xf32>,
    %c8_i32 = arith.constant 8 : i32
    %c0_70 = arith.constant 0 : index
    %c0_71 = arith.constant 0 : index
    %294 = vector.load %arg5[%c0_70, %c0_71] : memref<2x64xf32, #tpu.memory_space<vmem>>, vector<2x64xf32>
    tpu.vector_store %arg5[%c0_70, %c0_71], %289 {strides = array<i32>} : memref<2x64xf32, #tpu.memory_space<vmem>>, vector<2x64xf32>,
    return
  }
  func.func @transform_0(%arg0: i32) -> (i32, i32, i32) {
    %c0_i32 = arith.constant 0 : i32
    %c0_i32_0 = arith.constant 0 : i32
    %c0_i32_1 = arith.constant 0 : i32
    return %arg0, %c0_i32, %c0_i32_0 : i32, i32, i32
  }
  func.func @transform_1(%arg0: i32) -> (i32, i32) {
    %c0_i32 = arith.constant 0 : i32
    %c0_i32_0 = arith.constant 0 : i32
    %c0_i32_1 = arith.constant 0 : i32
    return %c0_i32, %c0_i32_0 : i32, i32
  }
  func.func @transform_2(%arg0: i32) -> (i32, i32) {
    %c0_i32 = arith.constant 0 : i32
    %c0_i32_0 = arith.constant 0 : i32
    %c0_i32_1 = arith.constant 0 : i32
    return %c0_i32, %c0_i32_0 : i32, i32
  }
  func.func @transform_3(%arg0: i32) -> (i32, i32, i32) {
    %c0_i32 = arith.constant 0 : i32
    %c0_i32_0 = arith.constant 0 : i32
    %c0_i32_1 = arith.constant 0 : i32
    return %arg0, %c0_i32, %c0_i32_0 : i32, i32, i32
  }
}

module attributes {stable_mosaic.version = 11 : i64} {
  func.func @_linear_kernel(%arg0: i32, %arg1: memref<16x64xf32, #tpu.memory_space<vmem>>, %arg2: memref<64x192xf32, #tpu.memory_space<vmem>>, %arg3: memref<1x192xf32, #tpu.memory_space<vmem>>, %arg4: memref<16x192xf32, #tpu.memory_space<vmem>>) attributes {dimension_semantics = [#tpu.dimension_semantics<parallel>], iteration_bounds = array<i64: 1>, scalar_prefetch = 0 : i64, scratch_operands = 0 : i64, tpu.core_type = #tpu.core_type<tc>, window_params = [{transform_indices = @transform_0, window_bounds = array<i64: 16, 64>}, {pipeline_mode = #tpu.pipeline_mode<synchronous>, transform_indices = @transform_1, window_bounds = array<i64: 64, 192>}, {pipeline_mode = #tpu.pipeline_mode<synchronous>, transform_indices = @transform_2, window_bounds = array<i64: 1, 192>}, {transform_indices = @transform_3, window_bounds = array<i64: 16, 192>}]} {
    %c0 = arith.constant 0 : index
    %c0_0 = arith.constant 0 : index
    %0 = vector.load %arg1[%c0, %c0_0] : memref<16x64xf32, #tpu.memory_space<vmem>>, vector<16x64xf32>
    %c0_1 = arith.constant 0 : index
    %c0_2 = arith.constant 0 : index
    %1 = vector.load %arg2[%c0_1, %c0_2] : memref<64x192xf32, #tpu.memory_space<vmem>>, vector<64x192xf32>
    %cst = arith.constant dense<0.000000e+00> : vector<16x192xf32>
    %2 = tpu.matmul %0, %1, %cst {dimension_numbers = #tpu.dot_dimension_numbers<[1], [0], [0], [1], [0, 0, 1, 1], [], []>} : vector<16x64xf32>, vector<64x192xf32>, vector<16x192xf32> -> vector<16x192xf32>
    %c0_3 = arith.constant 0 : index
    %c0_4 = arith.constant 0 : index
    %3 = vector.load %arg3[%c0_3, %c0_4] : memref<1x192xf32, #tpu.memory_space<vmem>>, vector<1x192xf32>
    %4 = vector.broadcast %3 : vector<1x192xf32> to vector<16x192xf32>
    %5 = arith.addf %2, %4 : vector<16x192xf32>
    %c0_5 = arith.constant 0 : index
    %c0_6 = arith.constant 0 : index
    %6 = vector.load %arg4[%c0_5, %c0_6] : memref<16x192xf32, #tpu.memory_space<vmem>>, vector<16x192xf32>
    tpu.vector_store %arg4[%c0_5, %c0_6], %5 {strides = array<i32>} : memref<16x192xf32, #tpu.memory_space<vmem>>, vector<16x192xf32>,
    return
  }
  func.func @transform_0(%arg0: i32) -> (i32, i32) {
    %c0_i32 = arith.constant 0 : i32
    %c0_i32_0 = arith.constant 0 : i32
    return %arg0, %c0_i32 : i32, i32
  }
  func.func @transform_1(%arg0: i32) -> (i32, i32) {
    %c0_i32 = arith.constant 0 : i32
    %c0_i32_0 = arith.constant 0 : i32
    %c0_i32_1 = arith.constant 0 : i32
    return %c0_i32, %c0_i32_0 : i32, i32
  }
  func.func @transform_2(%arg0: i32) -> (i32, i32) {
    %c0_i32 = arith.constant 0 : i32
    %c0_i32_0 = arith.constant 0 : i32
    %c0_i32_1 = arith.constant 0 : i32
    return %c0_i32, %c0_i32_0 : i32, i32
  }
  func.func @transform_3(%arg0: i32) -> (i32, i32) {
    %c0_i32 = arith.constant 0 : i32
    %c0_i32_0 = arith.constant 0 : i32
    return %arg0, %c0_i32 : i32, i32
  }
}

module attributes {stable_mosaic.version = 11 : i64} {
  func.func @_linear_kernel(%arg0: i32, %arg1: memref<16x64xf32, #tpu.memory_space<vmem>>, %arg2: memref<64x8xf32, #tpu.memory_space<vmem>>, %arg3: memref<1x8xf32, #tpu.memory_space<vmem>>, %arg4: memref<16x8xf32, #tpu.memory_space<vmem>>) attributes {dimension_semantics = [#tpu.dimension_semantics<parallel>], iteration_bounds = array<i64: 1>, scalar_prefetch = 0 : i64, scratch_operands = 0 : i64, tpu.core_type = #tpu.core_type<tc>, window_params = [{transform_indices = @transform_0, window_bounds = array<i64: 16, 64>}, {pipeline_mode = #tpu.pipeline_mode<synchronous>, transform_indices = @transform_1, window_bounds = array<i64: 64, 8>}, {pipeline_mode = #tpu.pipeline_mode<synchronous>, transform_indices = @transform_2, window_bounds = array<i64: 1, 8>}, {transform_indices = @transform_3, window_bounds = array<i64: 16, 8>}]} {
    %c0 = arith.constant 0 : index
    %c0_0 = arith.constant 0 : index
    %0 = vector.load %arg1[%c0, %c0_0] : memref<16x64xf32, #tpu.memory_space<vmem>>, vector<16x64xf32>
    %c0_1 = arith.constant 0 : index
    %c0_2 = arith.constant 0 : index
    %1 = vector.load %arg2[%c0_1, %c0_2] : memref<64x8xf32, #tpu.memory_space<vmem>>, vector<64x8xf32>
    %cst = arith.constant dense<0.000000e+00> : vector<16x8xf32>
    %2 = tpu.matmul %0, %1, %cst {dimension_numbers = #tpu.dot_dimension_numbers<[1], [0], [0], [1], [0, 0, 1, 1], [], []>} : vector<16x64xf32>, vector<64x8xf32>, vector<16x8xf32> -> vector<16x8xf32>
    %c0_3 = arith.constant 0 : index
    %c0_4 = arith.constant 0 : index
    %3 = vector.load %arg3[%c0_3, %c0_4] : memref<1x8xf32, #tpu.memory_space<vmem>>, vector<1x8xf32>
    %4 = vector.broadcast %3 : vector<1x8xf32> to vector<16x8xf32>
    %5 = arith.addf %2, %4 : vector<16x8xf32>
    %c0_5 = arith.constant 0 : index
    %c0_6 = arith.constant 0 : index
    %6 = vector.load %arg4[%c0_5, %c0_6] : memref<16x8xf32, #tpu.memory_space<vmem>>, vector<16x8xf32>
    tpu.vector_store %arg4[%c0_5, %c0_6], %5 {strides = array<i32>} : memref<16x8xf32, #tpu.memory_space<vmem>>, vector<16x8xf32>,
    return
  }
  func.func @transform_0(%arg0: i32) -> (i32, i32) {
    %c0_i32 = arith.constant 0 : i32
    %c0_i32_0 = arith.constant 0 : i32
    return %arg0, %c0_i32 : i32, i32
  }
  func.func @transform_1(%arg0: i32) -> (i32, i32) {
    %c0_i32 = arith.constant 0 : i32
    %c0_i32_0 = arith.constant 0 : i32
    %c0_i32_1 = arith.constant 0 : i32
    return %c0_i32, %c0_i32_0 : i32, i32
  }
  func.func @transform_2(%arg0: i32) -> (i32, i32) {
    %c0_i32 = arith.constant 0 : i32
    %c0_i32_0 = arith.constant 0 : i32
    %c0_i32_1 = arith.constant 0 : i32
    return %c0_i32, %c0_i32_0 : i32, i32
  }
  func.func @transform_3(%arg0: i32) -> (i32, i32) {
    %c0_i32 = arith.constant 0 : i32
    %c0_i32_0 = arith.constant 0 : i32
    return %arg0, %c0_i32 : i32, i32
  }
}

module attributes {stable_mosaic.version = 11 : i64} {
  func.func @_linear_kernel(%arg0: i32, %arg1: memref<2x128xf32, #tpu.memory_space<vmem>>, %arg2: memref<128x12xf32, #tpu.memory_space<vmem>>, %arg3: memref<1x12xf32, #tpu.memory_space<vmem>>, %arg4: memref<2x12xf32, #tpu.memory_space<vmem>>) attributes {dimension_semantics = [#tpu.dimension_semantics<parallel>], iteration_bounds = array<i64: 1>, scalar_prefetch = 0 : i64, scratch_operands = 0 : i64, tpu.core_type = #tpu.core_type<tc>, window_params = [{transform_indices = @transform_0, window_bounds = array<i64: 2, 128>}, {pipeline_mode = #tpu.pipeline_mode<synchronous>, transform_indices = @transform_1, window_bounds = array<i64: 128, 12>}, {pipeline_mode = #tpu.pipeline_mode<synchronous>, transform_indices = @transform_2, window_bounds = array<i64: 1, 12>}, {transform_indices = @transform_3, window_bounds = array<i64: 2, 12>}]} {
    %c0 = arith.constant 0 : index
    %c0_0 = arith.constant 0 : index
    %0 = vector.load %arg1[%c0, %c0_0] : memref<2x128xf32, #tpu.memory_space<vmem>>, vector<2x128xf32>
    %c0_1 = arith.constant 0 : index
    %c0_2 = arith.constant 0 : index
    %1 = vector.load %arg2[%c0_1, %c0_2] : memref<128x12xf32, #tpu.memory_space<vmem>>, vector<128x12xf32>
    %cst = arith.constant dense<0.000000e+00> : vector<2x12xf32>
    %2 = tpu.matmul %0, %1, %cst {dimension_numbers = #tpu.dot_dimension_numbers<[1], [0], [0], [1], [0, 0, 1, 1], [], []>} : vector<2x128xf32>, vector<128x12xf32>, vector<2x12xf32> -> vector<2x12xf32>
    %c0_3 = arith.constant 0 : index
    %c0_4 = arith.constant 0 : index
    %3 = vector.load %arg3[%c0_3, %c0_4] : memref<1x12xf32, #tpu.memory_space<vmem>>, vector<1x12xf32>
    %4 = vector.broadcast %3 : vector<1x12xf32> to vector<2x12xf32>
    %5 = arith.addf %2, %4 : vector<2x12xf32>
    %c0_5 = arith.constant 0 : index
    %c0_6 = arith.constant 0 : index
    %6 = vector.load %arg4[%c0_5, %c0_6] : memref<2x12xf32, #tpu.memory_space<vmem>>, vector<2x12xf32>
    tpu.vector_store %arg4[%c0_5, %c0_6], %5 {strides = array<i32>} : memref<2x12xf32, #tpu.memory_space<vmem>>, vector<2x12xf32>,
    return
  }
  func.func @transform_0(%arg0: i32) -> (i32, i32) {
    %c0_i32 = arith.constant 0 : i32
    %c0_i32_0 = arith.constant 0 : i32
    return %arg0, %c0_i32 : i32, i32
  }
  func.func @transform_1(%arg0: i32) -> (i32, i32) {
    %c0_i32 = arith.constant 0 : i32
    %c0_i32_0 = arith.constant 0 : i32
    %c0_i32_1 = arith.constant 0 : i32
    return %c0_i32, %c0_i32_0 : i32, i32
  }
  func.func @transform_2(%arg0: i32) -> (i32, i32) {
    %c0_i32 = arith.constant 0 : i32
    %c0_i32_0 = arith.constant 0 : i32
    %c0_i32_1 = arith.constant 0 : i32
    return %c0_i32, %c0_i32_0 : i32, i32
  }
  func.func @transform_3(%arg0: i32) -> (i32, i32) {
    %c0_i32 = arith.constant 0 : i32
    %c0_i32_0 = arith.constant 0 : i32
    return %arg0, %c0_i32 : i32, i32
  }
}

</mosaic_0001>

<bundles_post_ra>
// kernel: _lambda_.6
= control target key start
LH: loop header
LB: loop body
LE: loop exit
PB: predicated region body
PF: predicated region fallthrough
CT: control target
= control target key end

     0   :  { %8 = vsyncpa [#allocation3], 0  ;;  %s278_s0 = inlined_call_operand.vmem [shape: f32[16,4], index: 0, kind: input, shape index: {}]   ;;  %s279_s1 = inlined_call_operand.hbm [shape: f32[4,192], index: 1, kind: input, shape index: {}]   ;;  %s280_s2 = inlined_call_operand.hbm [shape: f32[1,192], index: 2, kind: input, shape index: {}]   ;;  %s281_s3 = inlined_call_operand.vmem [shape: f32[16,192], index: 3, kind: output, shape index: {}]  }
   0x1   :  { %9 = vsyncpa [#allocation5], 0  ;;  %s213_s12 = smov [#allocation2]   ;;  %s214_s14 = smov [#allocation4]  }
   0x2   :  { %s18_s13 = sshll.u32 %s213_s12, 4  ;;  %s28_s15 = sshll.u32 %s214_s14, 4  ;;  %s19_s13 = int_to_ptr.vmem [resolvable:$true] %s18_s13  ;;  %s29_s15 = int_to_ptr.vmem [resolvable:$true] %s28_s15 }
   0x3   :  { %s165_s18 = scalar_lea.hbm %s279_s1, 128 }
   0x4   :  { %p166_p0 = scmp.ne.s32.totalorder %s279_s1, %s165_s18  ;;  %p169_p1 = scmp.lt.u32.totalorder %s165_s18, %s279_s1 }
   0x6   :  { %p171_p2 = pnand %p169_p1, %p166_p0 }
   0x8   :  { %174 = shalt.err (!%p171_p2)
}
   0x9   :  { %s175_s23 = scalar_lea.vmem %s19_s13, 128  ;;  %p180_p4 = scmp.lt.s32.totalorder %s19_s13, %s19_s13 }
   0xa   :  { %p176_p3 = scmp.ne.s32.totalorder %s19_s13, %s175_s23  ;;  %p181_p5 = scmp.lt.s32.totalorder %s175_s23, %s175_s23 }
   0xc   :  { %p182_p6 = por %p181_p5, %p180_p4 }
   0xe   :  { %p183_p7 = pnand %p182_p6, %p176_p3 }
  0x10   :  { %186 = shalt.err (!%p183_p7)
}
  0x11   :  { %21 = dma.hbm_to_vmem [thread:$0]  %s279_s1, 128, %s19_s13, [#allocation3]  }
  0x12   :  { %s187_s28 = scalar_lea.hbm %s280_s2, 32 }
  0x13   :  { %p188_p8 = scmp.ne.s32.totalorder %s280_s2, %s187_s28  ;;  %p191_p9 = scmp.lt.u32.totalorder %s187_s28, %s280_s2 }
  0x15   :  { %p193_p10 = pnand %p191_p9, %p188_p8 }
  0x17   :  { %196 = shalt.err (!%p193_p10)
}
  0x18   :  { %s197_s6 = scalar_lea.vmem %s29_s15, 32  ;;  %p202_p12 = scmp.lt.s32.totalorder %s29_s15, %s29_s15 }
  0x19   :  { %p198_p11 = scmp.ne.s32.totalorder %s29_s15, %s197_s6  ;;  %p203_p13 = scmp.lt.s32.totalorder %s197_s6, %s197_s6 }
  0x1b   :  { %p204_p0 = por %p203_p13, %p202_p12 }
  0x1d   :  { %p205_p1 = pnand %p204_p0, %p198_p11 }
  0x1f   :  { %208 = shalt.err (!%p205_p1)
}
  0x20   :  { %31 = dma.hbm_to_vmem [thread:$0]  %s280_s2, 32, %s29_s15, [#allocation5]  }
  0x21   :  { %209 = dma.done.wait [#allocation3], 128  }
  0x22   :  { %210 = vsyncadd [#allocation3], 4294967168 }
  0x23   :  { %211 = dma.done.wait [#allocation5], 32  }
  0x24   :  { %212 = vsyncadd [#allocation5], 4294967264  ;;  %v215_v0 = vmov 0.0   ;;  %v40_v1 = vld [vmem:[#allocation2] sm:$0xff]  ;;  %vm62_vm0 = vcmask 1043456   ;;  %vm55_vm1 = vcmask 31744   ;;  %v43_v5 = vlaneseq }
  0x25   :  { %131 = vmatprep.mubr.f32.mxu0 %v215_v0  ;;  %137 = vmatprep.mubr.f32.mxu1 %v215_v0  ;;  %v54_v2 = vcombine.high %v40_v1, %v40_v1  ;;  %v38_v3 = vld [vmem:[%s278_s0] sm:$0xff]  ;;  %v39_v4 = vld [vmem:[%s278_s0 + $0x8] sm:$0xff]  ;;  %vm145_vm2 = vcmask 523264  }
  0x26   :  { %v44_v6 = vshrl.u32 %v43_v5, 7  ;;  %v41_v8 = vld [vmem:[#allocation4] sm:$0x3] }
  0x27   :  { %155 = vmatprep.subr.msk.mxu0 %vm62_vm0, %v54_v2  ;;  %159 = vmatprep.subr.msk.mxu1 %vm62_vm0, %v54_v2 }
  0x28   :  { %156 = vmatpush1.msk.msra.mxu0 %vm62_vm0, %v40_v1  ;;  %160 = vmatpush1.msk.msra.mxu1 %vm62_vm0, %v40_v1  ;;  %v45_v7 = vsub.s32 0, %v44_v6  ;;  %v49_v9 = vsub.s32 1, %v44_v6 }
  0x29   :  { %157 = vmatmul.mubr.msk.f32.vlgmr.msra.gmra.mrb[0].mxu0 %vm55_vm1, %v38_v3  ;;  %158 = vmatmul.mubr.msk.f32.vlgmr.msra.gmra.mrb[0].mxu1 %vm55_vm1, %v39_v4 }
  0x2a   :  { %v46_v10 = vrot.slane %v41_v8, %v45_v7  ;;  %v50_v11 = vrot.slane %v41_v8, %v49_v9 }
  0xfc   :  { %v133_v12 = vpop.f32.mrb[0].mxu0  ;;  %v139_v13 = vpop.f32.mrb[0].mxu1 }
  0xfd   :  { %v134_v14 = vadd.f32 %v133_v12, %v46_v10  ;;  %v140_v15 = vadd.f32 %v139_v13, %v46_v10  ;;  %v135_v16 = vpop.f32.mrb[1].mxu0  ;;  %v141_v17 = vpop.f32.mrb[1].mxu1 }
  0xfe   :  { %v136_v18 = vadd.f32 %v135_v16, %v50_v11  ;;  %v142_v19 = vadd.f32 %v141_v17, %v50_v11 }
  0xff   :  { %144 = vst [vmem:[%s281_s3] sm:$0xff] %v134_v14  ;;  %147 = vst [vmem:[%s281_s3 + $0x10] sm:$0xff] %v140_v15 }
 0x100   :  { %146 = vst.msk [vmem:[%s281_s3 + $0x8] sm:$0xff] %vm145_vm2, %v136_v18  ;;  %148 = vst.msk [vmem:[%s281_s3 + $0x18] sm:$0xff] %vm145_vm2, %v142_v19 }
 0x101   :  { %153 = vsyncpa [#allocation3], 1 }
 0x102   :  { %154 = vsyncpa [#allocation5], 1 }

// kernel: _lambda_.8
= control target key start
LH: loop header
LB: loop body
LE: loop exit
PB: predicated region body
PF: predicated region fallthrough
CT: control target
= control target key end

     0   :  { %v163_v3 = vmov 0.0   ;;  %vm44_vm0 = vcmask 523264   ;;  %v34_v27 = vlaneseq  ;;  %s257_s1 = inlined_call_operand.vmem [shape: f32[64,192], index: 1, kind: input, shape index: {}]   ;;  %s258_s0 = inlined_call_operand.vmem [shape: f32[16,64], index: 0, kind: input, shape index: {}]   ;;  %s259_s2 = inlined_call_operand.vmem [shape: f32[1,192], index: 2, kind: input, shape index: {}]   ;;  %s260_s3 = inlined_call_operand.vmem [shape: f32[16,192], index: 3, kind: output, shape index: {}]  }
   0x1   :  { %v17_v0 = vld [vmem:[%s257_s1 + $0x8] sm:$0xff]  ;;  %v19_v1 = vld [vmem:[%s257_s1 + $0x18] sm:$0xff]  ;;  %v16_v2 = vld [vmem:[%s257_s1] sm:$0xff]  ;;  %115 = vmatprep.mubr.f32.mxu0 %v163_v3  ;;  %121 = vmatprep.mubr.f32.mxu1 %v163_v3 }
   0x2   :  { %v138_v4 = vpack.c.bf16 %v19_v1, %v17_v0  ;;  %v18_v5 = vld [vmem:[%s257_s1 + $0x10] sm:$0xff]  ;;  %v21_v6 = vld [vmem:[%s257_s1 + $0x28] sm:$0xff]  ;;  %v23_v7 = vld [vmem:[%s257_s1 + $0x38] sm:$0xff]  ;;  %v35_v28 = vshrl.u32 %v34_v27, 7 }
   0x3   :  { %v140_v8 = vpack.c.bf16 %v18_v5, %v16_v2  ;;  %v142_v9 = vpack.c.bf16 %v23_v7, %v21_v6  ;;  %v20_v10 = vld [vmem:[%s257_s1 + $0x20] sm:$0xff]  ;;  %v22_v11 = vld [vmem:[%s257_s1 + $0x30] sm:$0xff]  ;;  %v25_v12 = vld [vmem:[%s257_s1 + $0x48] sm:$0xff] }
   0x4   :  { %139 = vmatprep.subr.bf16.mxu0 %v138_v4  ;;  %154 = vmatprep.subr.bf16.mxu1 %v138_v4  ;;  %v27_v13 = vld [vmem:[%s257_s1 + $0x58] sm:$0xff]  ;;  %v144_v14 = vpack.c.bf16 %v22_v11, %v20_v10  ;;  %v24_v16 = vld [vmem:[%s257_s1 + $0x40] sm:$0xff]  ;;  %v26_v17 = vld [vmem:[%s257_s1 + $0x50] sm:$0xff]  ;;  %v36_v29 = vsub.s32 0, %v35_v28  ;;  %v40_v31 = vsub.s32 1, %v35_v28 }
   0x5   :  { %141 = vmatpush1.bf16.msra.mxu0 %v140_v8  ;;  %158 = vmatpush1.bf16.msra.mxu1 %v140_v8  ;;  %v146_v15 = vpack.c.bf16 %v27_v13, %v25_v12  ;;  %v29_v18 = vld [vmem:[%s257_s1 + $0x68] sm:$0xff]  ;;  %v31_v19 = vld [vmem:[%s257_s1 + $0x78] sm:$0xff]  ;;  %v148_v20 = vpack.c.bf16 %v26_v17, %v24_v16  ;;  %v28_v22 = vld [vmem:[%s257_s1 + $0x60] sm:$0xff] }
   0x6   :  { %143 = vmatprep.subr.bf16.mxu0 %v142_v9  ;;  %155 = vmatprep.subr.bf16.mxu1 %v142_v9  ;;  %v150_v21 = vpack.c.bf16 %v31_v19, %v29_v18  ;;  %v30_v23 = vld [vmem:[%s257_s1 + $0x70] sm:$0xff]  ;;  %v14_v25 = vld [vmem:[%s258_s0] sm:$0xff]  ;;  %v15_v26 = vld [vmem:[%s258_s0 + $0x8] sm:$0xff] }
   0x7   :  { %v152_v24 = vpack.c.bf16 %v30_v23, %v28_v22  ;;  %v32_v30 = vld [vmem:[%s259_s2] sm:$0x3] }
   0x8   :  { %v37_v32 = vrot.slane %v32_v30, %v36_v29  ;;  %v41_v33 = vrot.slane %v32_v30, %v40_v31 }
   0x9   :  { %145 = vmatpush1.bf16.msra.mxu0 %v144_v14  ;;  %159 = vmatpush1.bf16.msra.mxu1 %v144_v14 }
   0xa   :  { %147 = vmatprep.subr.bf16.mxu0 %v146_v15  ;;  %156 = vmatprep.subr.bf16.mxu1 %v146_v15 }
   0xd   :  { %149 = vmatpush1.bf16.msra.mxu0 %v148_v20  ;;  %160 = vmatpush1.bf16.msra.mxu1 %v148_v20 }
   0xe   :  { %151 = vmatprep.subr.bf16.mxu0 %v150_v21  ;;  %157 = vmatprep.subr.bf16.mxu1 %v150_v21 }
  0x11   :  { %153 = vmatpush1.bf16.msra.mxu0 %v152_v24  ;;  %161 = vmatpush1.bf16.msra.mxu1 %v152_v24 }
  0x14   :  { %136 = vmatmul.mubr.msk.f32.vlgmr.msra.gmra.mrb[0].mxu0 %vm44_vm0, %v14_v25  ;;  %137 = vmatmul.mubr.msk.f32.vlgmr.msra.gmra.mrb[0].mxu1 %vm44_vm0, %v15_v26 }
  0xe7   :  { %v117_v34 = vpop.f32.mrb[0].mxu0  ;;  %v123_v35 = vpop.f32.mrb[0].mxu1 }
  0xe8   :  { %v118_v36 = vadd.f32 %v117_v34, %v37_v32  ;;  %v124_v37 = vadd.f32 %v123_v35, %v37_v32  ;;  %v119_v38 = vpop.f32.mrb[1].mxu0  ;;  %v125_v39 = vpop.f32.mrb[1].mxu1 }
  0xe9   :  { %v120_v40 = vadd.f32 %v119_v38, %v41_v33  ;;  %v126_v41 = vadd.f32 %v125_v39, %v41_v33 }
  0xea   :  { %128 = vst [vmem:[%s260_s3] sm:$0xff] %v118_v36  ;;  %130 = vst [vmem:[%s260_s3 + $0x10] sm:$0xff] %v124_v37 }
  0xeb   :  { %129 = vst.msk [vmem:[%s260_s3 + $0x8] sm:$0xff] %vm44_vm0, %v120_v40  ;;  %131 = vst.msk [vmem:[%s260_s3 + $0x18] sm:$0xff] %vm44_vm0, %v126_v41 }

// kernel: _lambda_.11
= control target key start
LH: loop header
LB: loop body
LE: loop exit
PB: predicated region body
PF: predicated region fallthrough
CT: control target
= control target key end

     0   :  { %vm32_vm0 = vcmask 523264   ;;  %s278_s0 = inlined_call_operand.vmem [shape: f32[16,64], index: 0, kind: input, shape index: {}]   ;;  %s279_s1 = inlined_call_operand.vmem [shape: f32[64,8], index: 1, kind: input, shape index: {}]   ;;  %s280_s2 = inlined_call_operand.vmem [shape: f32[1,8], index: 2, kind: input, shape index: {}]   ;;  %s281_s3 = inlined_call_operand.hbm [shape: f32[16,8], index: 3, kind: output, shape index: {}]  }
   0x1   :  { %v17_v0 = vld [vmem:[%s279_s1] sm:$0xff]  ;;  %v18_v1 = vld [vmem:[%s279_s1 + $0x8] sm:$0xff]  ;;  %v19_v2 = vld [vmem:[%s279_s1 + $0x10] sm:$0xff] }
   0x2   :  { %v165_v3 = vpack.c.bf16 %v18_v1, %v17_v0  ;;  %v20_v4 = vld [vmem:[%s279_s1 + $0x18] sm:$0xff]  ;;  %v21_v6 = vld [vmem:[%s279_s1 + $0x20] sm:$0xff]  ;;  %v22_v7 = vld [vmem:[%s279_s1 + $0x28] sm:$0xff] }
   0x3   :  { %v169_v5 = vpack.c.bf16 %v20_v4, %v19_v2  ;;  %v15_v8 = vld [vmem:[%s278_s0] sm:$0xff] }
   0x4   :  { %166 = vmatprep.subr.bf16.mxu0 %v165_v3  ;;  %162 = vmatprep.mubr.msk.f32.mxu0 %vm32_vm0, %v15_v8 }
   0x5   :  { %8 = vsyncpa [#allocation3], 0  ;;  %168 = vmatpush3.bf16.msra.mxu0 %v165_v3  ;;  %v173_v9 = vpack.c.bf16 %v22_v7, %v21_v6  ;;  %v23_v10 = vld [vmem:[%s279_s1 + $0x30] sm:$0xff]  ;;  %v24_v11 = vld [vmem:[%s279_s1 + $0x38] sm:$0xff]  ;;  %s208_s7 = smov [#allocation2]   ;;  %vm114_vm1 = vcmask 64512  }
   0x6   :  { %170 = vmatprep.subr.bf16.mxu0 %v169_v5  ;;  %v177_v12 = vpack.c.bf16 %v24_v11, %v23_v10  ;;  %v16_v13 = vld [vmem:[%s278_s0 + $0x8] sm:$0xff]  ;;  %v133_v14 = vld [vmem:[%s280_s2] ss:$0 sm:$0xff]  ;;  %s122_s8 = sshll.u32 %s208_s7, 4  ;;  %s123_s8 = int_to_ptr.vmem [resolvable:$true] %s122_s8 }
   0x7   :  { %s184_s1 = scalar_lea.vmem %s123_s8, 256  ;;  %p189_p1 = scmp.lt.s32.totalorder %s123_s8, %s123_s8 }
   0x8   :  { %p185_p0 = scmp.ne.s32.totalorder %s123_s8, %s184_s1  ;;  %p190_p2 = scmp.lt.s32.totalorder %s184_s1, %s184_s1 }
   0x9   :  { %172 = vmatpush3.bf16.msra.mxu0 %v169_v5 }
   0xa   :  { %174 = vmatprep.subr.bf16.mxu0 %v173_v9  ;;  %p191_p3 = por %p190_p2, %p189_p1 }
   0xc   :  { %p192_p4 = pnand %p191_p3, %p185_p0 }
   0xd   :  { %176 = vmatpush3.bf16.msra.mxu0 %v173_v9 }
   0xe   :  { %178 = vmatprep.subr.bf16.mxu0 %v177_v12 }
  0x11   :  { %180 = vmatpush3.bf16.msra.mxu0 %v177_v12 }
  0x14   :  { %163 = vmatmul.mubr.msk.f32.vlgmr.msra.gmra.mrb[0].mxu0 %vm32_vm0, %v16_v13 }
  0xe7   :  { %v164_v15 = vpop.f32.mrb[0].mxu0 }
  0xe8   :  { %v111_v16 = vadd.f32 %v164_v15, %v133_v14  ;;  %v105_v17 = vpop.f32.mrb[1].mxu0 }
  0xe9   :  { %v106_v18 = vadd.f32 %v133_v14, %v105_v17 }
  0xea   :  { %116 = vst.msk [vmem:[#allocation2 + $0x8] sm:$0xff] %vm114_vm1, %v111_v16 }
  0xeb   :  { %115 = vst.msk [vmem:[#allocation2] sm:$0xff] %vm114_vm1, %v106_v18 }
  0xec   :  { %195 = shalt.err (!%p192_p4)
}
  0xed   :  { %s196_s2 = scalar_lea.hbm %s281_s3, 256 }
  0xee   :  { %p197_p5 = scmp.ne.s32.totalorder %s281_s3, %s196_s2  ;;  %p200_p6 = scmp.lt.u32.totalorder %s196_s2, %s281_s3 }
  0xf0   :  { %p202_p7 = pnand %p200_p6, %p197_p5 }
  0xf2   :  { %205 = shalt.err (!%p202_p7)
}
  0xf3   :  { %s209_s14 = smov 128   ;;  %s210_s15 = smov 8  }
  0xf4   :  { %128 = dma.vmem_to_hbm [thread:$0]  %s123_s8, 256, %s281_s3, [#allocation3], %s209_s14, %s209_s14, %s210_s15  }
  0xf5   :  { %206 = dma.done.wait [#allocation3], 256  }
  0xf6   :  { %207 = vsyncadd [#allocation3], 4294967040 }
  0xf7   :  { %132 = vsyncpa [#allocation3], 1 }

// kernel: _lambda_.7
= control target key start
LH: loop header
LB: loop body
LE: loop exit
PB: predicated region body
PF: predicated region fallthrough
CT: control target
= control target key end

     0   :  { %vm18_vm0 = vcmask 517120   ;;  %v1146_v3 = vmov 0.0   ;;  %vm50_vm1 = vcmask 523264   ;;  %v40_v26 = vlaneseq  ;;  %s1423_s1 = inlined_call_operand.vmem [shape: f32[64,192], index: 1, kind: input, shape index: {}]   ;;  %s1424_s2 = inlined_call_operand.vmem [shape: f32[1,192], index: 2, kind: input, shape index: {}]   ;;  %s1425_s0 = inlined_call_operand.vmem [shape: f32[8,2,192], index: 0, kind: input, shape index: {}]   ;;  %s1426_s3 = inlined_call_operand.vmem [shape: f32[8,2,64], index: 3, kind: output, shape index: {}]  }
   0x1   :  { %v21_v0 = vld [vmem:[%s1423_s1 + $0x8] sm:$0xff]  ;;  %v23_v1 = vld [vmem:[%s1423_s1 + $0x18] sm:$0xff]  ;;  %v20_v2 = vld [vmem:[%s1423_s1] sm:$0xff]  ;;  %118 = vmatprep.mubr.f32.mxu0 %v1146_v3  ;;  %19 = vst.msk [vmem:[#allocation2] sm:$0x3] %vm18_vm0, %v1146_v3  ;;  %237 = vmatprep.mubr.f32.mxu1 %v1146_v3 }
   0x2   :  { %v1182_v4 = vpack.c.bf16 %v23_v1, %v21_v0  ;;  %v22_v5 = vld [vmem:[%s1423_s1 + $0x10] sm:$0xff]  ;;  %v25_v6 = vld [vmem:[%s1423_s1 + $0x28] sm:$0xff]  ;;  %v27_v7 = vld [vmem:[%s1423_s1 + $0x38] sm:$0xff]  ;;  %v41_v27 = vshrl.u32 %v40_v26, 7  ;;  %v1147_v46 = vmov 1983009808  }
   0x3   :  { %v1193_v8 = vpack.c.bf16 %v22_v5, %v20_v2  ;;  %v1195_v9 = vpack.c.bf16 %v27_v7, %v25_v6  ;;  %v24_v10 = vld [vmem:[%s1423_s1 + $0x20] sm:$0xff]  ;;  %v26_v11 = vld [vmem:[%s1423_s1 + $0x30] sm:$0xff]  ;;  %v29_v12 = vld [vmem:[%s1423_s1 + $0x48] sm:$0xff]  ;;  %v145_v47 = vunpack.c.l.s4 %v1147_v46 }
   0x4   :  { %968 = vmatprep.subr.bf16.mxu0 %v1182_v4  ;;  %v31_v13 = vld [vmem:[%s1423_s1 + $0x58] sm:$0xff]  ;;  %984 = vmatprep.subr.bf16.mxu1 %v1182_v4  ;;  %v1212_v14 = vpack.c.bf16 %v26_v11, %v24_v10  ;;  %v28_v16 = vld [vmem:[%s1423_s1 + $0x40] sm:$0xff]  ;;  %v30_v17 = vld [vmem:[%s1423_s1 + $0x50] sm:$0xff]  ;;  %v42_v28 = vsub.s32 0, %v41_v27  ;;  %v46_v39 = vsub.s32 1, %v41_v27 }
   0x5   :  { %970 = vmatpush1.bf16.msra.mxu0 %v1193_v8  ;;  %986 = vmatpush1.bf16.msra.mxu1 %v1193_v8  ;;  %v1216_v15 = vpack.c.bf16 %v31_v13, %v29_v12  ;;  %v33_v18 = vld [vmem:[%s1423_s1 + $0x68] sm:$0xff]  ;;  %v35_v19 = vld [vmem:[%s1423_s1 + $0x78] sm:$0xff]  ;;  %v1232_v20 = vpack.c.bf16 %v30_v17, %v28_v16  ;;  %v32_v22 = vld [vmem:[%s1423_s1 + $0x60] sm:$0xff]  ;;  %v146_v48 = vunpack.c.0.s8 %v145_v47 }
   0x6   :  { %972 = vmatprep.subr.bf16.mxu0 %v1195_v9  ;;  %988 = vmatprep.subr.bf16.mxu1 %v1195_v9  ;;  %v1236_v21 = vpack.c.bf16 %v35_v19, %v33_v18  ;;  %v34_v23 = vld [vmem:[%s1423_s1 + $0x70] sm:$0xff]  ;;  %v36_v29 = vld [vmem:[%s1424_s2] sm:$0x3]  ;;  %s1148_s2 = smov 64   ;;  %v939_v60 = vld [vmem:[%s1425_s0 + $0x4] sm:$0xf] }
   0x7   :  { %v1246_v24 = vpack.c.bf16 %v34_v23, %v32_v22  ;;  %v1268_v30 = vrot.slane %v36_v29, %v42_v28  ;;  %v38_v31 = vld [vmem:[%s1425_s0] sm:$0xf]  ;;  %v1274_v40 = vrot.slane %v36_v29, %v46_v39  ;;  %v1277_v49 = vsub.s32 %v146_v48, %v41_v27  ;;  %v943_v26 = vld [vmem:[%s1425_s0 + $0x8] sm:$0xf] }
   0x8   :  { %v37_v25 = vld [vmem:[#allocation2] sm:$0x3]  ;;  %v134_v41 = vrot.slane %v38_v31, 2  ;;  %v253_v6 = vrot.slane %v939_v60, 2 }
   0x9   :  { %974 = vmatpush1.bf16.msra.mxu0 %v1212_v14  ;;  %990 = vmatpush1.bf16.msra.mxu1 %v1212_v14  ;;  %v150_v51 = vrot.slane %v37_v25, %v1277_v49 }
   0xa   :  { %976 = vmatprep.subr.bf16.mxu0 %v1216_v15  ;;  %992 = vmatprep.subr.bf16.mxu1 %v1216_v15 }
   0xd   :  { %978 = vmatpush1.bf16.msra.mxu0 %v1232_v20  ;;  %994 = vmatpush1.bf16.msra.mxu1 %v1232_v20 }
   0xe   :  { %980 = vmatprep.subr.bf16.mxu0 %v1236_v21  ;;  %996 = vmatprep.subr.bf16.mxu1 %v1236_v21 }
  0x11   :  { %982 = vmatpush1.bf16.msra.mxu0 %v1246_v24  ;;  %998 = vmatpush1.bf16.msra.mxu1 %v1246_v24 }
  0x12   :  { %1000 = vmatprep.subr.bf16.mxu0 %v1182_v4  ;;  %1016 = vmatprep.subr.bf16.mxu1 %v1182_v4 }
  0x14   :  { %937 = vmatmul.mubr.msk.f32.vlgmr.msra.gmra.mrb[0].mxu0 %vm50_vm1, %v37_v25 }
  0x15   :  { %1002 = vmatpush1.bf16.msra.mxu0 %v1193_v8  ;;  %346 = vmatprep.mubr.f32.mxu0 %v1146_v3 }
  0x16   :  { %1004 = vmatprep.subr.bf16.mxu0 %v1195_v9 }
  0x19   :  { %1006 = vmatpush1.bf16.msra.mxu0 %v1212_v14 }
  0x1a   :  { %1008 = vmatprep.subr.bf16.mxu0 %v1216_v15 }
  0x1d   :  { %1010 = vmatpush1.bf16.msra.mxu0 %v1232_v20 }
  0x1e   :  { %1012 = vmatprep.subr.bf16.mxu0 %v1236_v21 }
  0x21   :  { %1014 = vmatpush1.bf16.msra.mxu0 %v1246_v24 }
  0x22   :  { %1032 = vmatprep.subr.bf16.mxu0 %v1182_v4 }
  0xe7   :  { %v120_v32 = vpop.f32.mrb[0].mxu0 }
  0xe8   :  { %v121_v33 = vadd.f32 %v120_v32, %v1268_v30  ;;  %v122_v34 = vpop.f32.mrb[1].mxu0 }
  0xe9   :  { %v123_v42 = vadd.f32 %v122_v34, %v1274_v40 }
  0xea   :  { %v125_v35 = vadd.f32 %v121_v33, %v38_v31 }
  0xec   :  { %v938_v36 = vmul.f32 -1.442695, %v125_v35  ;;  %v362_v35 = vrot.slane %v943_v26, 2 }
  0xee   :  { %1098 = vpow2.f32 %v938_v36 }
  0xf8   :  { %v1099_v37 = vpop.eup %1098 }
  0xf9   :  { %v129_v38 = vadd.f32 1.0, %v1099_v37 }
  0xfb   :  { %1100 = vrcp.f32 %v129_v38 }
 0x105   :  { %v1101_v43 = vpop.eup %1100 }
 0x106   :  { %v132_v44 = vmul.f32 %v1101_v43, %v123_v42  ;;  %v138_v53 = vsub.f32 1.0, %v1101_v43 }
 0x108   :  { %v136_v45 = vadd.f32 %v134_v41, %v132_v44 }
 0x10a   :  { %1102 = vtanh.f32 %v136_v45 }
 0x114   :  { %v1103_v50 = vpop.eup %1102 }
 0x115   :  { %140 = vrot.lane.b32.xlu0 %v1103_v50, %s1148_s2  ;;  %v947_v50 = vld [vmem:[%s1425_s0 + $0xc] sm:$0xf] }
 0x119   :  { %151 = vrot.lane.b32.xlu0 %v150_v51, %s1148_s2 }
 0x187   :  { %v141_v52 = vpop.permute.xlu0 %140 }
 0x188   :  { %v143_v55 = vmul.f32 %v141_v52, %v138_v53 }
 0x18b   :  { %v152_v54 = vpop.permute.xlu0 %151 }
 0x18c   :  { %v154_v56 = vmul.f32 %v1101_v43, %v152_v54 }
 0x18e   :  { %v155_v57 = vadd.f32 %v154_v56, %v143_v55 }
 0x190   :  { %v163_v58 = vrot.slane %v155_v57, %v1277_v49 }
 0x192   :  { %164 = vrot.lane.b32.xlu1 %v163_v58, %s1148_s2  ;;  %v471_v58 = vrot.slane %v947_v50, 2 }
 0x204   :  { %v165_v59 = vpop.permute.xlu1 %164 }
 0x205   :  { %168 = vst.msk [vmem:[%s1426_s3] sm:$0x3] %vm18_vm0, %v165_v59  ;;  %940 = vmatmul.mubr.msk.f32.vlgmr.msra.gmra.mrb[0].mxu1 %vm50_vm1, %v165_v59 }
 0x206   :  { %1018 = vmatpush1.bf16.msra.mxu1 %v1193_v8  ;;  %455 = vmatprep.mubr.f32.mxu1 %v1146_v3 }
 0x207   :  { %1020 = vmatprep.subr.bf16.mxu1 %v1195_v9 }
 0x20a   :  { %1022 = vmatpush1.bf16.msra.mxu1 %v1212_v14 }
 0x20b   :  { %1024 = vmatprep.subr.bf16.mxu1 %v1216_v15 }
 0x20e   :  { %1026 = vmatpush1.bf16.msra.mxu1 %v1232_v20 }
 0x20f   :  { %1028 = vmatprep.subr.bf16.mxu1 %v1236_v21 }
 0x212   :  { %1030 = vmatpush1.bf16.msra.mxu1 %v1246_v24 }
 0x213   :  { %1048 = vmatprep.subr.bf16.mxu1 %v1182_v4 }
 0x2d8   :  { %v239_v61 = vpop.f32.mrb[0].mxu1 }
 0x2d9   :  { %v240_v62 = vadd.f32 %v239_v61, %v1268_v30  ;;  %v241_v63 = vpop.f32.mrb[1].mxu1 }
 0x2da   :  { %v242_v7 = vadd.f32 %v241_v63, %v1274_v40 }
 0x2db   :  { %v244_v0 = vadd.f32 %v939_v60, %v240_v62 }
 0x2dd   :  { %v941_v1 = vmul.f32 -1.442695, %v244_v0 }
 0x2df   :  { %1104 = vpow2.f32 %v941_v1 }
 0x2e9   :  { %v1105_v2 = vpop.eup %1104 }
 0x2ea   :  { %v248_v5 = vadd.f32 1.0, %v1105_v2 }
 0x2ec   :  { %1106 = vrcp.f32 %v248_v5 }
 0x2f6   :  { %v1107_v10 = vpop.eup %1106 }
 0x2f7   :  { %v251_v11 = vmul.f32 %v1107_v10, %v242_v7  ;;  %v257_v16 = vsub.f32 1.0, %v1107_v10  ;;  %v263_v18 = vmul.f32 %v1107_v10, %v155_v57  ;;  %v951_v10 = vld [vmem:[%s1425_s0 + $0x10] sm:$0xf] }
 0x2f9   :  { %v255_v12 = vadd.f32 %v253_v6, %v251_v11 }
 0x2fb   :  { %1108 = vtanh.f32 %v255_v12 }
 0x305   :  { %v1109_v13 = vpop.eup %1108 }
 0x306   :  { %259 = vrot.lane.b32.xlu1 %v1109_v13, %s1148_s2 }
 0x378   :  { %v260_v17 = vpop.permute.xlu1 %259 }
 0x379   :  { %v262_v19 = vmul.f32 %v260_v17, %v257_v16 }
 0x37b   :  { %v264_v22 = vadd.f32 %v263_v18, %v262_v19 }
 0x37d   :  { %v272_v23 = vrot.slane %v264_v22, %v1277_v49 }
 0x37f   :  { %273 = vrot.lane.b32.xlu0 %v272_v23, %s1148_s2 }
 0x3f1   :  { %v274_v25 = vpop.permute.xlu0 %273 }
 0x3f2   :  { %942 = vst.msk [vmem:[%s1426_s3 + $0x2] sm:$0x3] %vm18_vm0, %v274_v25  ;;  %944 = vmatmul.mubr.msk.f32.vlgmr.msra.gmra.mrb[2].mxu0 %vm50_vm1, %v274_v25 }
 0x3f3   :  { %1034 = vmatpush1.bf16.msra.mxu0 %v1193_v8  ;;  %564 = vmatprep.mubr.f32.mxu0 %v1146_v3 }
 0x3f4   :  { %1036 = vmatprep.subr.bf16.mxu0 %v1195_v9 }
 0x3f7   :  { %1038 = vmatpush1.bf16.msra.mxu0 %v1212_v14 }
 0x3f8   :  { %1040 = vmatprep.subr.bf16.mxu0 %v1216_v15 }
 0x3fb   :  { %1042 = vmatpush1.bf16.msra.mxu0 %v1232_v20 }
 0x3fc   :  { %1044 = vmatprep.subr.bf16.mxu0 %v1236_v21 }
 0x3ff   :  { %1046 = vmatpush1.bf16.msra.mxu0 %v1246_v24 }
 0x400   :  { %1064 = vmatprep.subr.bf16.mxu0 %v1182_v4 }
 0x4c5   :  { %v348_v27 = vpop.f32.mrb[2].mxu0 }
 0x4c6   :  { %v349_v28 = vadd.f32 %v348_v27, %v1268_v30  ;;  %v350_v29 = vpop.f32.mrb[3].mxu0 }
 0x4c7   :  { %v351_v36 = vadd.f32 %v350_v29, %v1274_v40 }
 0x4c8   :  { %v353_v31 = vadd.f32 %v943_v26, %v349_v28 }
 0x4ca   :  { %v945_v32 = vmul.f32 -1.442695, %v353_v31 }
 0x4cc   :  { %1110 = vpow2.f32 %v945_v32 }
 0x4d6   :  { %v1111_v33 = vpop.eup %1110 }
 0x4d7   :  { %v357_v34 = vadd.f32 1.0, %v1111_v33 }
 0x4d9   :  { %1112 = vrcp.f32 %v357_v34 }
 0x4e3   :  { %v1113_v37 = vpop.eup %1112 }
 0x4e4   :  { %v360_v38 = vmul.f32 %v1113_v37, %v351_v36  ;;  %v366_v42 = vsub.f32 1.0, %v1113_v37  ;;  %v372_v44 = vmul.f32 %v1113_v37, %v264_v22  ;;  %v580_v22 = vrot.slane %v951_v10, 2  ;;  %v955_v37 = vld [vmem:[%s1425_s0 + $0x14] sm:$0xf] }
 0x4e6   :  { %v364_v39 = vadd.f32 %v362_v35, %v360_v38 }
 0x4e8   :  { %1114 = vtanh.f32 %v364_v39 }
 0x4f2   :  { %v1115_v41 = vpop.eup %1114 }
 0x4f3   :  { %368 = vrot.lane.b32.xlu1 %v1115_v41, %s1148_s2 }
 0x565   :  { %v369_v43 = vpop.permute.xlu1 %368 }
 0x566   :  { %v371_v45 = vmul.f32 %v369_v43, %v366_v42 }
 0x568   :  { %v373_v46 = vadd.f32 %v372_v44, %v371_v45 }
 0x56a   :  { %v381_v47 = vrot.slane %v373_v46, %v1277_v49 }
 0x56c   :  { %382 = vrot.lane.b32.xlu0 %v381_v47, %s1148_s2 }
 0x5de   :  { %v383_v48 = vpop.permute.xlu0 %382 }
 0x5df   :  { %946 = vst.msk [vmem:[%s1426_s3 + $0x4] sm:$0x3] %vm18_vm0, %v383_v48  ;;  %948 = vmatmul.mubr.msk.f32.vlgmr.msra.gmra.mrb[2].mxu1 %vm50_vm1, %v383_v48 }
 0x5e0   :  { %1050 = vmatpush1.bf16.msra.mxu1 %v1193_v8  ;;  %673 = vmatprep.mubr.f32.mxu1 %v1146_v3 }
 0x5e1   :  { %1052 = vmatprep.subr.bf16.mxu1 %v1195_v9 }
 0x5e4   :  { %1054 = vmatpush1.bf16.msra.mxu1 %v1212_v14 }
 0x5e5   :  { %1056 = vmatprep.subr.bf16.mxu1 %v1216_v15 }
 0x5e8   :  { %1058 = vmatpush1.bf16.msra.mxu1 %v1232_v20 }
 0x5e9   :  { %1060 = vmatprep.subr.bf16.mxu1 %v1236_v21 }
 0x5ec   :  { %1062 = vmatpush1.bf16.msra.mxu1 %v1246_v24 }
 0x5ed   :  { %1080 = vmatprep.subr.bf16.mxu1 %v1182_v4 }
 0x6b2   :  { %v457_v51 = vpop.f32.mrb[2].mxu1 }
 0x6b3   :  { %v458_v52 = vadd.f32 %v457_v51, %v1268_v30  ;;  %v459_v53 = vpop.f32.mrb[3].mxu1 }
 0x6b4   :  { %v460_v59 = vadd.f32 %v459_v53, %v1274_v40 }
 0x6b5   :  { %v462_v54 = vadd.f32 %v947_v50, %v458_v52  ;;  %v959_v52 = vld [vmem:[%s1425_s0 + $0x18] sm:$0xf] }
 0x6b7   :  { %v949_v55 = vmul.f32 -1.442695, %v462_v54 }
 0x6b9   :  { %1116 = vpow2.f32 %v949_v55 }
 0x6c3   :  { %v1117_v56 = vpop.eup %1116 }
 0x6c4   :  { %v466_v57 = vadd.f32 1.0, %v1117_v56 }
 0x6c6   :  { %1118 = vrcp.f32 %v466_v57 }
 0x6d0   :  { %v1119_v60 = vpop.eup %1118 }
 0x6d1   :  { %v469_v61 = vmul.f32 %v1119_v60, %v460_v59  ;;  %v475_v63 = vsub.f32 1.0, %v1119_v60  ;;  %v481_v1 = vmul.f32 %v1119_v60, %v373_v46  ;;  %v798_v60 = vrot.slane %v959_v52, 2 }
 0x6d3   :  { %v473_v4 = vadd.f32 %v471_v58, %v469_v61 }
 0x6d5   :  { %1120 = vtanh.f32 %v473_v4 }
 0x6df   :  { %v1121_v62 = vpop.eup %1120 }
 0x6e0   :  { %477 = vrot.lane.b32.xlu1 %v1121_v62, %s1148_s2 }
 0x752   :  { %v478_v0 = vpop.permute.xlu1 %477 }
 0x753   :  { %v480_v2 = vmul.f32 %v478_v0, %v475_v63 }
 0x755   :  { %v482_v5 = vadd.f32 %v481_v1, %v480_v2 }
 0x757   :  { %v490_v6 = vrot.slane %v482_v5, %v1277_v49 }
 0x759   :  { %491 = vrot.lane.b32.xlu0 %v490_v6, %s1148_s2 }
 0x7cb   :  { %v492_v7 = vpop.permute.xlu0 %491 }
 0x7cc   :  { %950 = vst.msk [vmem:[%s1426_s3 + $0x6] sm:$0x3] %vm18_vm0, %v492_v7  ;;  %952 = vmatmul.mubr.msk.f32.vlgmr.msra.gmra.mrb[4].mxu0 %vm50_vm1, %v492_v7 }
 0x7cd   :  { %1066 = vmatpush1.bf16.msra.mxu0 %v1193_v8  ;;  %782 = vmatprep.mubr.f32.mxu0 %v1146_v3 }
 0x7ce   :  { %1068 = vmatprep.subr.bf16.mxu0 %v1195_v9 }
 0x7d1   :  { %1070 = vmatpush1.bf16.msra.mxu0 %v1212_v14 }
 0x7d2   :  { %1072 = vmatprep.subr.bf16.mxu0 %v1216_v15 }
 0x7d5   :  { %1074 = vmatpush1.bf16.msra.mxu0 %v1232_v20 }
 0x7d6   :  { %1076 = vmatprep.subr.bf16.mxu0 %v1236_v21 }
 0x7d9   :  { %1078 = vmatpush1.bf16.msra.mxu0 %v1246_v24 }
 0x89f   :  { %v566_v11 = vpop.f32.mrb[4].mxu0 }
 0x8a0   :  { %v567_v12 = vadd.f32 %v566_v11, %v1268_v30  ;;  %v568_v13 = vpop.f32.mrb[5].mxu0 }
 0x8a1   :  { %v569_v23 = vadd.f32 %v568_v13, %v1274_v40 }
 0x8a2   :  { %v571_v16 = vadd.f32 %v951_v10, %v567_v12  ;;  %v963_v12 = vld [vmem:[%s1425_s0 + $0x1c] sm:$0xf] }
 0x8a4   :  { %v953_v17 = vmul.f32 -1.442695, %v571_v16 }
 0x8a6   :  { %1122 = vpow2.f32 %v953_v17 }
 0x8b0   :  { %v1123_v18 = vpop.eup %1122 }
 0x8b1   :  { %v575_v19 = vadd.f32 1.0, %v1123_v18 }
 0x8b3   :  { %1124 = vrcp.f32 %v575_v19 }
 0x8bd   :  { %v1125_v25 = vpop.eup %1124 }
 0x8be   :  { %v578_v26 = vmul.f32 %v1125_v25, %v569_v23  ;;  %v584_v29 = vsub.f32 1.0, %v1125_v25  ;;  %v590_v32 = vmul.f32 %v1125_v25, %v482_v5  ;;  %v907_v25 = vrot.slane %v963_v12, 2 }
 0x8c0   :  { %v582_v27 = vadd.f32 %v580_v22, %v578_v26 }
 0x8c2   :  { %1126 = vtanh.f32 %v582_v27 }
 0x8cc   :  { %v1127_v28 = vpop.eup %1126 }
 0x8cd   :  { %586 = vrot.lane.b32.xlu1 %v1127_v28, %s1148_s2 }
 0x93f   :  { %v587_v31 = vpop.permute.xlu1 %586 }
 0x940   :  { %v589_v33 = vmul.f32 %v587_v31, %v584_v29 }
 0x942   :  { %v591_v34 = vadd.f32 %v590_v32, %v589_v33 }
 0x944   :  { %v599_v35 = vrot.slane %v591_v34, %v1277_v49 }
 0x946   :  { %600 = vrot.lane.b32.xlu0 %v599_v35, %s1148_s2 }
 0x9b8   :  { %v601_v36 = vpop.permute.xlu0 %600 }
 0x9b9   :  { %954 = vst.msk [vmem:[%s1426_s3 + $0x8] sm:$0x3] %vm18_vm0, %v601_v36  ;;  %956 = vmatmul.mubr.msk.f32.vlgmr.msra.gmra.mrb[4].mxu1 %vm50_vm1, %v601_v36 }
 0x9ba   :  { %1082 = vmatpush1.bf16.msra.mxu1 %v1193_v8  ;;  %891 = vmatprep.mubr.f32.mxu1 %v1146_v3 }
 0x9bb   :  { %1084 = vmatprep.subr.bf16.mxu1 %v1195_v9 }
 0x9be   :  { %1086 = vmatpush1.bf16.msra.mxu1 %v1212_v14 }
 0x9bf   :  { %1088 = vmatprep.subr.bf16.mxu1 %v1216_v15  ;;  %v689_v15 = vrot.slane %v955_v37, 2 }
 0x9c2   :  { %1090 = vmatpush1.bf16.msra.mxu1 %v1232_v20 }
 0x9c3   :  { %1092 = vmatprep.subr.bf16.mxu1 %v1236_v21 }
 0x9c6   :  { %1094 = vmatpush1.bf16.msra.mxu1 %v1246_v24 }
 0xa8c   :  { %v675_v38 = vpop.f32.mrb[4].mxu1 }
 0xa8d   :  { %v676_v8 = vadd.f32 %v675_v38, %v1268_v30  ;;  %v677_v3 = vpop.f32.mrb[5].mxu1 }
 0xa8e   :  { %v678_v20 = vadd.f32 %v677_v3, %v1274_v40 }
 0xa8f   :  { %v680_v39 = vadd.f32 %v955_v37, %v676_v8 }
 0xa91   :  { %v957_v9 = vmul.f32 -1.442695, %v680_v39 }
 0xa93   :  { %1128 = vpow2.f32 %v957_v9 }
 0xa9d   :  { %v1129_v14 = vpop.eup %1128 }
 0xa9e   :  { %v684_v41 = vadd.f32 1.0, %v1129_v14 }
 0xaa0   :  { %1130 = vrcp.f32 %v684_v41 }
 0xaaa   :  { %v1131_v21 = vpop.eup %1130 }
 0xaab   :  { %v687_v42 = vmul.f32 %v1131_v21, %v678_v20  ;;  %v693_v44 = vsub.f32 1.0, %v1131_v21  ;;  %v699_v46 = vmul.f32 %v1131_v21, %v591_v34 }
 0xaad   :  { %v691_v24 = vadd.f32 %v689_v15, %v687_v42 }
 0xaaf   :  { %1132 = vtanh.f32 %v691_v24 }
 0xab9   :  { %v1133_v43 = vpop.eup %1132 }
 0xaba   :  { %695 = vrot.lane.b32.xlu1 %v1133_v43, %s1148_s2 }
 0xb2c   :  { %v696_v45 = vpop.permute.xlu1 %695 }
 0xb2d   :  { %v698_v47 = vmul.f32 %v696_v45, %v693_v44 }
 0xb2f   :  { %v700_v48 = vadd.f32 %v699_v46, %v698_v47 }
 0xb31   :  { %v708_v50 = vrot.slane %v700_v48, %v1277_v49 }
 0xb33   :  { %709 = vrot.lane.b32.xlu0 %v708_v50, %s1148_s2 }
 0xba5   :  { %v710_v51 = vpop.permute.xlu0 %709 }
 0xba6   :  { %958 = vst.msk [vmem:[%s1426_s3 + $0xa] sm:$0x3] %vm18_vm0, %v710_v51  ;;  %960 = vmatmul.mubr.msk.f32.vlgmr.msra.gmra.mrb[6].mxu0 %vm50_vm1, %v710_v51 }
 0xc79   :  { %v784_v53 = vpop.f32.mrb[6].mxu0 }
 0xc7a   :  { %v785_v54 = vadd.f32 %v784_v53, %v1268_v30  ;;  %v786_v55 = vpop.f32.mrb[7].mxu0 }
 0xc7b   :  { %v787_v61 = vadd.f32 %v786_v55, %v1274_v40 }
 0xc7c   :  { %v789_v56 = vadd.f32 %v959_v52, %v785_v54 }
 0xc7e   :  { %v961_v57 = vmul.f32 -1.442695, %v789_v56 }
 0xc80   :  { %1134 = vpow2.f32 %v961_v57 }
 0xc8a   :  { %v1135_v58 = vpop.eup %1134 }
 0xc8b   :  { %v793_v59 = vadd.f32 1.0, %v1135_v58 }
 0xc8d   :  { %1136 = vrcp.f32 %v793_v59 }
 0xc97   :  { %v1137_v4 = vpop.eup %1136 }
 0xc98   :  { %v796_v62 = vmul.f32 %v1137_v4, %v787_v61  ;;  %v802_v1 = vsub.f32 1.0, %v1137_v4  ;;  %v808_v5 = vmul.f32 %v1137_v4, %v700_v48 }
 0xc9a   :  { %v800_v63 = vadd.f32 %v798_v60, %v796_v62 }
 0xc9c   :  { %1138 = vtanh.f32 %v800_v63 }
 0xca6   :  { %v1139_v0 = vpop.eup %1138 }
 0xca7   :  { %804 = vrot.lane.b32.xlu1 %v1139_v0, %s1148_s2 }
 0xd19   :  { %v805_v2 = vpop.permute.xlu1 %804 }
 0xd1a   :  { %v807_v6 = vmul.f32 %v805_v2, %v802_v1 }
 0xd1c   :  { %v809_v7 = vadd.f32 %v808_v5, %v807_v6 }
 0xd1e   :  { %v817_v10 = vrot.slane %v809_v7, %v1277_v49 }
 0xd20   :  { %818 = vrot.lane.b32.xlu0 %v817_v10, %s1148_s2 }
 0xd92   :  { %v819_v11 = vpop.permute.xlu0 %818 }
 0xd93   :  { %962 = vst.msk [vmem:[%s1426_s3 + $0xc] sm:$0x3] %vm18_vm0, %v819_v11  ;;  %964 = vmatmul.mubr.msk.f32.vlgmr.msra.gmra.mrb[6].mxu1 %vm50_vm1, %v819_v11 }
 0xe66   :  { %v893_v13 = vpop.f32.mrb[6].mxu1 }
 0xe67   :  { %v894_v16 = vadd.f32 %v893_v13, %v1268_v30  ;;  %v895_v17 = vpop.f32.mrb[7].mxu1 }
 0xe68   :  { %v896_v26 = vadd.f32 %v895_v17, %v1274_v40 }
 0xe69   :  { %v898_v18 = vadd.f32 %v963_v12, %v894_v16 }
 0xe6b   :  { %v965_v19 = vmul.f32 -1.442695, %v898_v18 }
 0xe6d   :  { %1140 = vpow2.f32 %v965_v19 }
 0xe77   :  { %v1141_v22 = vpop.eup %1140 }
 0xe78   :  { %v902_v23 = vadd.f32 1.0, %v1141_v22 }
 0xe7a   :  { %1142 = vrcp.f32 %v902_v23 }
 0xe84   :  { %v1143_v27 = vpop.eup %1142 }
 0xe85   :  { %v905_v28 = vmul.f32 %v1143_v27, %v896_v26  ;;  %v911_v32 = vsub.f32 1.0, %v1143_v27  ;;  %v917_v30 = vmul.f32 %v1143_v27, %v809_v7 }
 0xe87   :  { %v909_v29 = vadd.f32 %v907_v25, %v905_v28 }
 0xe89   :  { %1144 = vtanh.f32 %v909_v29 }
 0xe93   :  { %v1145_v31 = vpop.eup %1144 }
 0xe94   :  { %913 = vrot.lane.b32.xlu1 %v1145_v31, %s1148_s2 }
 0xf06   :  { %v914_v33 = vpop.permute.xlu1 %913 }
 0xf07   :  { %v916_v34 = vmul.f32 %v914_v33, %v911_v32 }
 0xf09   :  { %v918_v35 = vadd.f32 %v917_v30, %v916_v34 }
 0xf0b   :  { %v926_v36 = vrot.slane %v918_v35, %v1277_v49 }
 0xf0d   :  { %927 = vrot.lane.b32.xlu0 %v926_v36, %s1148_s2 }
 0xf7f   :  { %v928_v37 = vpop.permute.xlu0 %927 }
 0xf80   :  { %966 = vst.msk [vmem:[%s1426_s3 + $0xe] sm:$0x3] %vm18_vm0, %v928_v37  ;;  %932 = vst.msk [vmem:[#allocation2] sm:$0x3] %vm18_vm0, %v928_v37 }

// kernel: _lambda_.10
= control target key start
LH: loop header
LB: loop body
LE: loop exit
PB: predicated region body
PF: predicated region fallthrough
CT: control target
= control target key end

     0   :  { %v230_v3 = vmov 0.0|0.0   ;;  %vm231_vm0 = vmmov 0   ;;  %v232_v6 = vmov 0.0   ;;  %s320_s0 = inlined_call_operand.vmem [shape: f32[2,128], index: 0, kind: input, shape index: {}]   ;;  %s321_s1 = inlined_call_operand.vmem [shape: f32[128,12], index: 1, kind: input, shape index: {}]   ;;  %s322_s2 = inlined_call_operand.vmem [shape: f32[1,12], index: 2, kind: input, shape index: {}]   ;;  %s323_s3 = inlined_call_operand.hbm [shape: f32[2,12], index: 3, kind: output, shape index: {}]  }
   0x1   :  { %v16_v0 = vld [vmem:[%s321_s1] sm:$0xff]  ;;  %v17_v1 = vld [vmem:[%s321_s1 + $0x8] sm:$0xff]  ;;  %v18_v2 = vld [vmem:[%s321_s1 + $0x10] sm:$0xff]  ;;  %178 = vmatprep.subr.bf16.mxu0 %v230_v3  ;;  %175 = vmatprep.mubr.msk.f32.mxu0 %vm231_vm0, %v232_v6 }
   0x2   :  { %v179_v4 = vpack.c.bf16 %v17_v1, %v16_v0  ;;  %v19_v5 = vld [vmem:[%s321_s1 + $0x18] sm:$0xff]  ;;  %v20_v8 = vld [vmem:[%s321_s1 + $0x20] sm:$0xff]  ;;  %v21_v9 = vld [vmem:[%s321_s1 + $0x28] sm:$0xff] }
   0x3   :  { %v182_v7 = vpack.c.bf16 %v19_v5, %v18_v2 }
   0x4   :  { %180 = vmatpush3.bf16.msra.mxu0 %v179_v4 }
   0x5   :  { %181 = vmatprep.subr.bf16.mxu0 %v230_v3 }
   0x6   :  { %8 = vsyncpa [#allocation3], 0  ;;  %v185_v10 = vpack.c.bf16 %v21_v9, %v20_v8  ;;  %v22_v11 = vld [vmem:[%s321_s1 + $0x30] sm:$0xff]  ;;  %v23_v12 = vld [vmem:[%s321_s1 + $0x38] sm:$0xff]  ;;  %s233_s21 = smov [#allocation2]   ;;  %vm109_vm1 = vcmask 91136  }
   0x7   :  { %v188_v13 = vpack.c.bf16 %v23_v12, %v22_v11  ;;  %v24_v14 = vld [vmem:[%s321_s1 + $0x40] sm:$0xff]  ;;  %v25_v15 = vld [vmem:[%s321_s1 + $0x48] sm:$0xff]  ;;  %v26_v17 = vld [vmem:[%s321_s1 + $0x50] sm:$0xff]  ;;  %s117_s22 = sshll.u32 %s233_s21, 4  ;;  %s118_s22 = int_to_ptr.vmem [resolvable:$true] %s117_s22 }
   0x8   :  { %183 = vmatpush3.bf16.msra.mxu0 %v182_v7  ;;  %v191_v16 = vpack.c.bf16 %v25_v15, %v24_v14  ;;  %v27_v18 = vld [vmem:[%s321_s1 + $0x58] sm:$0xff]  ;;  %v28_v20 = vld [vmem:[%s321_s1 + $0x60] sm:$0xff]  ;;  %v29_v21 = vld [vmem:[%s321_s1 + $0x68] sm:$0xff]  ;;  %p211_p1 = scmp.lt.s32.totalorder %s118_s22, %s118_s22 }
   0x9   :  { %184 = vmatprep.subr.bf16.mxu0 %v230_v3  ;;  %v194_v19 = vpack.c.bf16 %v27_v18, %v26_v17  ;;  %v197_v22 = vpack.c.bf16 %v29_v21, %v28_v20  ;;  %v30_v23 = vld [vmem:[%s321_s1 + $0x70] sm:$0xff]  ;;  %v31_v24 = vld [vmem:[%s321_s1 + $0x78] sm:$0xff]  ;;  %v15_v26 = vld [vmem:[%s320_s0] sm:$0x3]  ;;  %s206_s1 = scalar_lea.vmem %s118_s22, 32 }
   0xa   :  { %v200_v25 = vpack.c.bf16 %v31_v24, %v30_v23  ;;  %v125_v27 = vld [vmem:[%s322_s2] ss:$0 sm:$0xff]  ;;  %p207_p0 = scmp.ne.s32.totalorder %s118_s22, %s206_s1  ;;  %p212_p2 = scmp.lt.s32.totalorder %s206_s1, %s206_s1 }
   0xc   :  { %186 = vmatpush3.bf16.msra.mxu0 %v185_v10  ;;  %p213_p3 = por %p212_p2, %p211_p1 }
   0xd   :  { %187 = vmatprep.subr.bf16.mxu0 %v230_v3 }
   0xe   :  { %p214_p4 = pnand %p213_p3, %p207_p0 }
  0x10   :  { %189 = vmatpush3.bf16.msra.mxu0 %v188_v13 }
  0x11   :  { %190 = vmatprep.subr.bf16.mxu0 %v230_v3 }
  0x14   :  { %192 = vmatpush3.bf16.msra.mxu0 %v191_v16 }
  0x15   :  { %193 = vmatprep.subr.bf16.mxu0 %v230_v3 }
  0x18   :  { %195 = vmatpush3.bf16.msra.mxu0 %v194_v19 }
  0x19   :  { %196 = vmatprep.subr.bf16.mxu0 %v230_v3 }
  0x1c   :  { %198 = vmatpush3.bf16.msra.mxu0 %v197_v22 }
  0x1d   :  { %199 = vmatprep.subr.bf16.mxu0 %v230_v3 }
  0x20   :  { %201 = vmatpush3.bf16.msra.mxu0 %v200_v25 }
  0x23   :  { %176 = vmatmul.mubr.f32.vlgmr.msra.gmra.mrb[0].mxu0 %v15_v26 }
  0xf6   :  { %v105_v28 = vpop.f32.mrb[0].mxu0 }
  0xf7   :  { %v106_v29 = vadd.f32 %v125_v27, %v105_v28  ;;  %v177_v30 = vpop.f32.mrb[1].mxu0 }
  0xf9   :  { %110 = vst.msk [vmem:[#allocation2] sm:$0x3] %vm109_vm1, %v106_v29 }
  0xfa   :  { %217 = shalt.err (!%p214_p4)
}
  0xfb   :  { %s218_s24 = scalar_lea.hbm %s323_s3, 32 }
  0xfc   :  { %p219_p5 = scmp.ne.s32.totalorder %s323_s3, %s218_s24  ;;  %p222_p6 = scmp.lt.u32.totalorder %s218_s24, %s323_s3 }
  0xfe   :  { %p224_p7 = pnand %p222_p6, %p219_p5 }
 0x100   :  { %227 = shalt.err (!%p224_p7)
}
 0x101   :  { %120 = dma.vmem_to_hbm [thread:$0]  %s118_s22, 32, %s323_s3, [#allocation3]  }
 0x102   :  { %228 = dma.done.wait [#allocation3], 32  }
 0x103   :  { %229 = vsyncadd [#allocation3], 4294967264 }
 0x104   :  { %124 = vsyncpa [#allocation3], 1 }

</bundles_post_ra>
